<compile_context>
chip_gen: v5e
topology: v5e:2x2
jax: 0.10.0
libtpu: 0.0.40
codegen_flags: <defaults>
</compile_context>

<pallas_src>
import functools
import math

import numpy as np
import jax
import jax.numpy as jnp
from jax.experimental import pallas as pl
from jax.experimental.pallas import tpu as pltpu

# ----------------------------------------------------------------------------
# Config (mirrors the fields DiffusionNet reads from config.diffusion/settings).
# ----------------------------------------------------------------------------
CFG = dict(
    beta_schedule="linear",
    beta_start=1e-4,
    beta_end=2e-2,
    num_diffusion_timesteps=20,
    sampling_timesteps=4,
    hfrm_hidden=64,      # HFRM(in_channels=3, out_channels=64)
    unet_hidden=32,
    temb_dim=32,
)

# MXU operand dtype.  float32 = exact parity with the PyTorch reference.
# jnp.bfloat16 halves matmul-operand traffic on v5e/v6e/v7x (f32 accumulation kept).
MXU_DTYPE = jnp.float32


def get_beta_schedule(beta_schedule, *, beta_start, beta_end, num_diffusion_timesteps):
    def sigmoid(x):
        return 1 / (np.exp(-x) + 1)

    if beta_schedule == "quad":
        betas = np.linspace(beta_start ** 0.5, beta_end ** 0.5,
                            num_diffusion_timesteps, dtype=np.float64) ** 2
    elif beta_schedule == "linear":
        betas = np.linspace(beta_start, beta_end, num_diffusion_timesteps,
                            dtype=np.float64)
    elif beta_schedule == "const":
        betas = beta_end * np.ones(num_diffusion_timesteps, dtype=np.float64)
    elif beta_schedule == "jsd":
        betas = 1.0 / np.linspace(num_diffusion_timesteps, 1,
                                  num_diffusion_timesteps, dtype=np.float64)
    elif beta_schedule == "sigmoid":
        betas = np.linspace(-6, 6, num_diffusion_timesteps)
        betas = sigmoid(betas) * (beta_end - beta_start) + beta_start
    else:
        raise NotImplementedError(beta_schedule)
    assert betas.shape == (num_diffusion_timesteps,)
    return betas


# Host-precomputed schedules (fixed config, not learned): the DDIM per-step alphas
# become compile-time Python floats -> zero SMEM / HBM traffic for them.
BETAS_NP = get_beta_schedule(
    CFG["beta_schedule"],
    beta_start=CFG["beta_start"],
    beta_end=CFG["beta_end"],
    num_diffusion_timesteps=CFG["num_diffusion_timesteps"],
)
ALPHAS_CUMPROD_NP = np.cumprod(1.0 - BETAS_NP)                           # (T,)
ALPHAS_CUMPROD_ONE_NP = np.concatenate([np.ones(1), ALPHAS_CUMPROD_NP])  # index with t+1

_SMEM_SPEC = pl.BlockSpec(memory_space=pltpu.MemorySpace.SMEM)


def _pick_lane_tile(m, max_tile=16384):
    """Largest lane (last-dim) tile: full array when small, else a big 128-multiple."""
    if m <= max_tile:
        return m
    for t in (16384, 8192, 4096, 2048, 1024, 512, 256, 128):
        if t <= max_tile and m % t == 0:
            return t
    return m


# ----------------------------------------------------------------------------
# Kernels
# ----------------------------------------------------------------------------
def _dwt_kernel(xq_ref, out_ref, *, normalize):
    """Haar DWT on parity-major data.

    xq rows: 0=(even row, even col)=x1, 1=(even,odd)=x3, 2=(odd,even)=x2, 3=(odd,odd)=x4.
    out rows: 0=LL, 1=HL, 2=LH, 3=HH (matches torch.cat((LL,HL,LH,HH),0) after reshape).
    `normalize` folds data_transform (2x-1):  (2x-1)*0.5 == x - 0.5.
    """
    x = xq_ref[...]                                   # (4, TM)
    f = (lambda v: v - 0.5) if normalize else (lambda v: v * 0.5)
    x1 = f(x[0:1])
    x3 = f(x[1:2])
    x2 = f(x[2:3])
    x4 = f(x[3:4])
    ll = x1 + x2 + x3 + x4
    hl = -x1 - x2 + x3 + x4
    lh = -x1 + x2 - x3 + x4
    hh = x1 - x2 - x3 + x4
    out_ref[...] = jnp.concatenate([ll, hl, lh, hh], axis=0)


def _iwt_kernel(xq_ref, out_ref, *, clamp):
    """Inverse Haar DWT; output rows are parity-major (rp*2+cp): ee, eo, oe, oo.

    `clamp` folds inverse_data_transform (pointwise, commutes with the interleave).
    """
    x = xq_ref[...]                                   # (4, TM) = [LL|HL|LH|HH]
    x1 = x[0:1] * 0.5
    x2 = x[1:2] * 0.5
    x3 = x[2:3] * 0.5
    x4 = x[3:4] * 0.5
    ee = x1 - x2 - x3 + x4   # h[:, :, 0::2, 0::2]
    eo = x1 + x2 - x3 - x4   # h[:, :, 0::2, 1::2]
    oe = x1 - x2 + x3 - x4   # h[:, :, 1::2, 0::2]
    oo = x1 + x2 + x3 + x4   # h[:, :, 1::2, 1::2]
    if clamp:
        post = lambda v: jnp.clip((v + 1.0) * 0.5, 0.0, 1.0)
        ee, eo, oe, oo = post(ee), post(eo), post(oe), post(oo)
    out_ref[...] = jnp.concatenate([ee, eo, oe, oo], axis=0)


def _hfrm_kernel(x_ref, w1t_ref, b1_ref, w2t_ref, b2_ref, o_ref):
    """Fused residual 1x1-conv MLP on the native (1, c, t_hw) block (lane-dense hw)."""
    x = x_ref[0]                                      # (3, t_hw)
    cast = lambda v: v.astype(MXU_DTYPE)
    h1 = jnp.dot(cast(w1t_ref[...]), cast(x),
                 preferred_element_type=jnp.float32) + b1_ref[...]
    h1 = jnp.maximum(h1, 0.0)                         # (hid, t_hw)
    o = jnp.dot(cast(w2t_ref[...]), cast(h1),
                preferred_element_type=jnp.float32) + b2_ref[...] + x
    o_ref[0] = o.astype(o_ref.dtype)                  # lane-dense store


def _unet_train_kernel(sa_ref, s1a_ref, xc_ref, gt_ref, e_ref, temb_ref,
                       wtt_ref, bt_ref, w1at_ref, w1bt_ref, b1_ref, w2t_ref, b2_ref,
                       o_ref):
    """Training eps-prediction with the noise mix fused in (x_noisy never hits HBM)."""
    b = pl.program_id(0)
    xc = xc_ref[0]                                    # (3, t_hw)
    xt = gt_ref[0] * sa_ref[b] + e_ref[0] * s1a_ref[b]
    temb = temb_ref[0]                                # (1, td)
    cast = lambda v: v.astype(MXU_DTYPE)

    temb_h = jnp.sum(wtt_ref[...] * temb, axis=1, keepdims=True) + bt_ref[...]
    temb_h = jnp.maximum(temb_h, 0.0)                 # (uh, 1)

    h1 = (jnp.dot(cast(w1at_ref[...]), cast(xc), preferred_element_type=jnp.float32)
          + jnp.dot(cast(w1bt_ref[...]), cast(xt), preferred_element_type=jnp.float32)
          + temb_h + b1_ref[...])
    h1 = jnp.maximum(h1, 0.0)                         # (uh, t_hw)

    et = (jnp.dot(cast(w2t_ref[...]), cast(h1), preferred_element_type=jnp.float32)
          + b2_ref[...])
    o_ref[0] = et.astype(o_ref.dtype)


def _unet_sample_kernel(xc_ref, xinit_ref, temb_ref,
                        wtt_ref, bt_ref, w1at_ref, w1bt_ref, b1_ref, w2t_ref, b2_ref,
                        o_ref, *, ddim_steps):
    """Fully fused DDIM sampling: all steps run in-kernel, xt never round-trips HBM.

    ddim_steps is a static tuple of (1/sqrt(at), sqrt(1-at), sqrt(at_next), c2);
    eta == 0 -> c1 == 0, so the c1 * randn term vanishes exactly.
    """
    xc = xc_ref[0]                                    # (3, t_hw)
    xt = xinit_ref[0].astype(jnp.float32)
    cast = lambda v: v.astype(MXU_DTYPE)

    # Loop-invariant: the x_cond half of the first layer.
    h1_c = jnp.dot(cast(w1at_ref[...]), cast(xc), preferred_element_type=jnp.float32)

    for s, (inv_sqrt_at, sqrt_1m_at, sqrt_at_next, c2) in enumerate(ddim_steps):
        temb = temb_ref[s]                            # (1, td), static step index
        temb_h = jnp.sum(wtt_ref[...] * temb, axis=1, keepdims=True) + bt_ref[...]
        temb_h = jnp.maximum(temb_h, 0.0)             # (uh, 1)

        h1 = (h1_c
              + jnp.dot(cast(w1bt_ref[...]), cast(xt), preferred_element_type=jnp.float32)
              + temb_h + b1_ref[...])
        h1 = jnp.maximum(h1, 0.0)
        et = (jnp.dot(cast(w2t_ref[...]), cast(h1), preferred_element_type=jnp.float32)
              + b2_ref[...])

        x0_t = (xt - et * sqrt_1m_at) * inv_sqrt_at
        xt = sqrt_at_next * x0_t + c2 * et

    o_ref[0] = xt.astype(o_ref.dtype)


# ----------------------------------------------------------------------------
# Wrappers
# ----------------------------------------------------------------------------
def dwt(x, *, normalize=False):
    """Haar DWT (optionally fused with data_transform).

    One XLA transpose to a parity-major (4, M) layout, one lane-dense Pallas kernel.
    Returns (LL, HIGH) with HIGH = concat([HL, LH, HH], axis=0), matching the
    reference cat((LL,HL,LH,HH),0) split at [:n] / [n:].
    """
    n, c, h, w = x.shape
    h2, w2 = h // 2, w // 2
    m = n * c * h2 * w2
    # (n,c,h2,rp,w2,cp) -> (rp,cp,n,c,h2,w2) -> (4, M): one materializing transpose.
    xq = jnp.transpose(x.reshape(n, c, h2, 2, w2, 2), (3, 5, 0, 1, 2, 4)).reshape(4, m)
    tm = _pick_lane_tile(m)
    out = pl.pallas_call(
        functools.partial(_dwt_kernel, normalize=normalize),
        grid=(m // tm,),
        in_specs=[pl.BlockSpec((4, tm), lambda i: (0, i))],
        out_specs=pl.BlockSpec((4, tm), lambda i: (0, i)),
        out_shape=jax.ShapeDtypeStruct((4, m), x.dtype),
        compiler_params=pltpu.CompilerParams(dimension_semantics=("parallel",)),
    )(xq)
    out = out.reshape(4 * n, c, h2, w2)
    return out[:n], out[n:]


def iwt(ll, high, *, clamp=False):
    """Inverse Haar DWT of (LL, [HL|LH|HH]); clamp fuses inverse_data_transform."""
    n, c, h2, w2 = ll.shape
    m = n * c * h2 * w2
    xq = jnp.concatenate([ll, high], axis=0).reshape(4, m)
    tm = _pick_lane_tile(m)
    out = pl.pallas_call(
        functools.partial(_iwt_kernel, clamp=clamp),
        grid=(m // tm,),
        in_specs=[pl.BlockSpec((4, tm), lambda i: (0, i))],
        out_specs=pl.BlockSpec((4, tm), lambda i: (0, i)),
        out_shape=jax.ShapeDtypeStruct((4, m), ll.dtype),
        compiler_params=pltpu.CompilerParams(dimension_semantics=("parallel",)),
    )(xq)
    # (rp,cp,n,c,h2,w2) -> (n,c,h2,rp,w2,cp) -> (n,c,h,w): one materializing transpose.
    out = jnp.transpose(out.reshape(2, 2, n, c, h2, w2), (2, 3, 4, 0, 5, 1))
    return out.reshape(n, c, 2 * h2, 2 * w2)


def hfrm_forward(p, x):
    """Fused HFRM stand-in (3 -> 64 -> 3 residual) on the native (B, c, hw) layout."""
    bsz, c, h, w = x.shape
    hw = h * w
    x3 = x.reshape(bsz, c, hw)                        # free row-major reshape
    t_hw = _pick_lane_tile(hw, max_tile=16384)
    hid = p["w1T"].shape[0]
    out3 = pl.pallas_call(
        _hfrm_kernel,
        grid=(bsz, hw // t_hw),
        in_specs=[
            pl.BlockSpec((1, c, t_hw), lambda b, i: (b, 0, i)),
            pl.BlockSpec((hid, c), lambda b, i: (0, 0)),
            pl.BlockSpec((hid, 1), lambda b, i: (0, 0)),
            pl.BlockSpec((c, hid), lambda b, i: (0, 0)),
            pl.BlockSpec((c, 1), lambda b, i: (0, 0)),
        ],
        out_specs=pl.BlockSpec((1, c, t_hw), lambda b, i: (b, 0, i)),
        out_shape=jax.ShapeDtypeStruct((bsz, c, hw), x.dtype),
        compiler_params=pltpu.CompilerParams(
            dimension_semantics=("parallel", "parallel")),
    )(x3, p["w1T"], p["b1"], p["w2T"], p["b2"])
    return out3.reshape(bsz, c, h, w)


def timestep_embedding(t, dim):
    half = dim // 2
    freqs = jnp.exp(-math.log(10000.0) * jnp.arange(half, dtype=jnp.float32) / half)
    args = t.astype(jnp.float32)[:, None] * freqs[None, :]
    return jnp.concatenate([jnp.sin(args), jnp.cos(args)], axis=-1)


def unet_train(p, xc3, gt3, e3, sa, s1a, temb3):
    """Training eps-predictor with the noise mix fused in; grid=(n, hw_tiles)."""
    n, c, hw = xc3.shape
    td = temb3.shape[-1]
    uh = p["w1aT"].shape[0]
    t_hw = _pick_lane_tile(hw, max_tile=8192)
    return pl.pallas_call(
        _unet_train_kernel,
        grid=(n, hw // t_hw),
        in_specs=[
            _SMEM_SPEC,                                             # sqrt(a)       (n,)
            _SMEM_SPEC,                                             # sqrt(1-a)     (n,)
            pl.BlockSpec((1, c, t_hw), lambda b, i: (b, 0, i)),     # x_cond
            pl.BlockSpec((1, c, t_hw), lambda b, i: (b, 0, i)),     # gt_LL_LL
            pl.BlockSpec((1, c, t_hw), lambda b, i: (b, 0, i)),     # e
            pl.BlockSpec((1, 1, td), lambda b, i: (b, 0, 0)),       # temb (per batch)
            pl.BlockSpec((uh, td), lambda b, i: (0, 0)),
            pl.BlockSpec((uh, 1), lambda b, i: (0, 0)),
            pl.BlockSpec((uh, c), lambda b, i: (0, 0)),
            pl.BlockSpec((uh, c), lambda b, i: (0, 0)),
            pl.BlockSpec((uh, 1), lambda b, i: (0, 0)),
            pl.BlockSpec((c, uh), lambda b, i: (0, 0)),
            pl.BlockSpec((c, 1), lambda b, i: (0, 0)),
        ],
        out_specs=pl.BlockSpec((1, c, t_hw), lambda b, i: (b, 0, i)),
        out_shape=jax.ShapeDtypeStruct((n, c, hw), jnp.float32),
        compiler_params=pltpu.CompilerParams(
            dimension_semantics=("parallel", "parallel")),
    )(sa, s1a, xc3, gt3, e3, temb3, p["wtT"], p["bt"], p["w1aT"], p["w1bT"],
      p["b1"], p["w2T"], p["b2"])


def unet_sample(p, xc3, x_init, temb_all, ddim_steps):
    """All DDIM sampling steps in one pallas_call; x_init buffer is reused for xt."""
    n, c, hw = xc3.shape
    s_steps, _, td = temb_all.shape
    uh = p["w1aT"].shape[0]
    t_hw = _pick_lane_tile(hw, max_tile=8192)
    return pl.pallas_call(
        functools.partial(_unet_sample_kernel, ddim_steps=ddim_steps),
        grid=(n, hw // t_hw),
        in_specs=[
            pl.BlockSpec((1, c, t_hw), lambda b, i: (b, 0, i)),     # x_cond
            pl.BlockSpec((1, c, t_hw), lambda b, i: (b, 0, i)),     # initial noise
            pl.BlockSpec((s_steps, 1, td), lambda b, i: (0, 0, 0)),  # per-step temb
            pl.BlockSpec((uh, td), lambda b, i: (0, 0)),
            pl.BlockSpec((uh, 1), lambda b, i: (0, 0)),
            pl.BlockSpec((uh, c), lambda b, i: (0, 0)),
            pl.BlockSpec((uh, c), lambda b, i: (0, 0)),
            pl.BlockSpec((uh, 1), lambda b, i: (0, 0)),
            pl.BlockSpec((c, uh), lambda b, i: (0, 0)),
            pl.BlockSpec((c, 1), lambda b, i: (0, 0)),
        ],
        out_specs=pl.BlockSpec((1, c, t_hw), lambda b, i: (b, 0, i)),
        out_shape=jax.ShapeDtypeStruct((n, c, hw), jnp.float32),
        input_output_aliases={1: 0},   # DDIM state reuses the noise buffer
        compiler_params=pltpu.CompilerParams(
            dimension_semantics=("parallel", "parallel")),
    )(xc3, x_init, temb_all, p["wtT"], p["bt"], p["w1aT"], p["w1bT"],
      p["b1"], p["w2T"], p["b2"])


# ----------------------------------------------------------------------------
# DiffusionNet
# ----------------------------------------------------------------------------
def sample_training(unet_params, x_cond, key, eta=0.0):
    t_steps = CFG["num_diffusion_timesteps"]
    skip = t_steps // CFG["sampling_timesteps"]
    seq = list(range(0, t_steps, skip))
    seq_next = [-1] + seq[:-1]
    n, c, h, w = x_cond.shape
    hw = h * w
    xc3 = x_cond.reshape(n, c, hw)
    x_init = jax.random.normal(key, (n, c, hw), jnp.float32)

    steps, t_list = [], []
    for i, j in zip(reversed(seq), reversed(seq_next)):
        at = float(ALPHAS_CUMPROD_ONE_NP[i + 1])
        at_next = float(ALPHAS_CUMPROD_ONE_NP[j + 1])
        # eta == 0 -> c1 == 0 exactly; c2 = sqrt(1 - at_next).
        steps.append((1.0 / math.sqrt(at), math.sqrt(1.0 - at),
                      math.sqrt(at_next), math.sqrt(1.0 - at_next)))
        t_list.append(float(i))
    temb_all = timestep_embedding(jnp.asarray(t_list, jnp.float32),
                                  CFG["temb_dim"])[:, None, :]       # (S, 1, td)

    out3 = unet_sample(unet_params, xc3, x_init, temb_all, tuple(steps))
    return out3.reshape(n, c, h, w)


@functools.partial(jax.jit, static_argnames=("training",))
def diffusion_net_forward(params, x, key, *, training=False):
    data_dict = {}
    t_steps = CFG["num_diffusion_timesteps"]

    input_img = x[:, :3, :, :]
    input_ll, input_high0 = dwt(input_img, normalize=True)           # data_transform fused
    input_high0 = hfrm_forward(params["hfrm0"], input_high0)
    input_ll_ll, input_high1 = dwt(input_ll, normalize=False)
    input_high1 = hfrm_forward(params["hfrm1"], input_high1)

    key, kt, ke, ks = jax.random.split(key, 4)
    nb, c_, h_, w_ = input_ll_ll.shape
    hw = h_ * w_

    if training:
        t = jax.random.randint(kt, (nb // 2 + 1,), 0, t_steps)
        t = jnp.concatenate([t, t_steps - t - 1], axis=0)[:nb]
        e = jax.random.normal(ke, input_ll_ll.shape, jnp.float32)

        gt_ll, gt_high0 = dwt(x[:, 3:, :, :], normalize=True)
        gt_ll_ll, gt_high1 = dwt(gt_ll, normalize=False)

        a = jnp.asarray(ALPHAS_CUMPROD_NP, jnp.float32)[t]           # (n,)
        sa = jnp.sqrt(a)
        s1a = jnp.sqrt(1.0 - a)
        temb = timestep_embedding(t.astype(jnp.float32), CFG["temb_dim"])[:, None, :]

        noise_output = unet_train(
            params["unet"], input_ll_ll.reshape(nb, c_, hw),
            gt_ll_ll.reshape(nb, c_, hw), e.reshape(nb, c_, hw),
            sa, s1a, temb).reshape(nb, c_, h_, w_)

        denoise_ll_ll = sample_training(params["unet"], input_ll_ll, ks)
        pred_ll = iwt(denoise_ll_ll, input_high1, clamp=False)
        pred_x = iwt(pred_ll, input_high0, clamp=True)                # inverse_data_transform fused

        data_dict["input_high0"] = input_high0
        data_dict["input_high1"] = input_high1
        data_dict["gt_high0"] = gt_high0
        data_dict["gt_high1"] = gt_high1
        data_dict["pred_LL"] = pred_ll
        data_dict["gt_LL"] = gt_ll
        data_dict["noise_output"] = noise_output
        data_dict["pred_x"] = pred_x
        data_dict["e"] = e
    else:
        denoise_ll_ll = sample_training(params["unet"], input_ll_ll, ks)
        pred_ll = iwt(denoise_ll_ll, input_high1, clamp=False)
        pred_x = iwt(pred_ll, input_high0, clamp=True)
        data_dict["pred_x"] = pred_x
    return data_dict


# ----------------------------------------------------------------------------
# Deterministic parameter init (weights stored pre-transposed / lane-dense).
# ----------------------------------------------------------------------------
def _dense(key, fan_in, fan_out):
    w = jax.random.normal(key, (fan_in, fan_out), jnp.float32) / jnp.sqrt(float(fan_in))
    b = jnp.zeros((fan_out, 1), jnp.float32)
    return w, b


def _hfrm_params(k1, k2, hid):
    w1, b1 = _dense(k1, 3, hid)
    w2, b2 = _dense(k2, hid, 3)
    return {"w1T": w1.T, "b1": b1, "w2T": w2.T, "b2": b2}


def _unet_params(ktm, k1, k2, uh, td):
    wt, bt = _dense(ktm, td, uh)
    w1, b1 = _dense(k1, 6, uh)     # 6 = concat([x_cond(3), x_t(3)]) channels
    w2, b2 = _dense(k2, uh, 3)
    return {"wtT": wt.T, "bt": bt,
            "w1aT": w1[:3].T, "w1bT": w1[3:].T, "b1": b1,
            "w2T": w2.T, "b2": b2}


def init_params(key):
    ks = jax.random.split(key, 7)
    hid = CFG["hfrm_hidden"]
    uh = CFG["unet_hidden"]
    td = CFG["temb_dim"]
    return {
        "hfrm0": _hfrm_params(ks[0], ks[1], hid),
        "hfrm1": _hfrm_params(ks[2], ks[3], hid),
        "unet": _unet_params(ks[4], ks[5], ks[6], uh, td),
    }


if __name__ == "__main__":
    key = jax.random.PRNGKey(0)
    kx, kp, kf = jax.random.split(key, 3)
    # x carries [input | gt] along channels, like the PyTorch module expects.
    x = jax.random.uniform(kx, (2, 6, 16, 16), dtype=jnp.float32)
    params = init_params(kp)

    out_eval = diffusion_net_forward(params, x, kf, training=False)
    out_train = diffusion_net_forward(params, x, kf, training=True)

    jax.block_until_ready(out_eval["pred_x"])
    jax.block_until_ready(out_train["pred_x"])

    assert out_eval["pred_x"].shape == (2, 3, 16, 16)
    assert out_train["noise_output"].shape == (2, 3, 4, 4)
    assert out_train["pred_LL"].shape == (2, 3, 8, 8)
    assert bool(jnp.all(out_eval["pred_x"] >= 0.0) & jnp.all(out_eval["pred_x"] <= 1.0))
    print("KERNEL_OK")
</pallas_src>

<mosaic_0001>
module attributes {stable_mosaic.version = 11 : i64} {
  func.func @_dwt_kernel(%arg0: i32, %arg1: memref<4x384xf32, #tpu.memory_space<vmem>>, %arg2: memref<4x384xf32, #tpu.memory_space<vmem>>) attributes {dimension_semantics = [#tpu.dimension_semantics<parallel>], iteration_bounds = array<i64: 1>, scalar_prefetch = 0 : i64, scratch_operands = 0 : i64, tpu.core_type = #tpu.core_type<tc>, window_params = [{transform_indices = @transform_0, window_bounds = array<i64: 4, 384>}, {transform_indices = @transform_1, window_bounds = array<i64: 4, 384>}]} {
    %c0 = arith.constant 0 : index
    %c0_0 = arith.constant 0 : index
    %0 = vector.load %arg1[%c0, %c0_0] : memref<4x384xf32, #tpu.memory_space<vmem>>, vector<4x384xf32>
    %1 = vector.extract_strided_slice %0 {offsets = [0, 0], sizes = [1, 384], strides = [1, 1]} : vector<4x384xf32> to vector<1x384xf32>
    %cst = arith.constant 5.000000e-01 : f32
    %2 = vector.broadcast %cst : f32 to vector<1x384xf32>
    %3 = arith.subf %1, %2 : vector<1x384xf32>
    %4 = vector.extract_strided_slice %0 {offsets = [1, 0], sizes = [1, 384], strides = [1, 1]} : vector<4x384xf32> to vector<1x384xf32>
    %cst_1 = arith.constant 5.000000e-01 : f32
    %5 = vector.broadcast %cst_1 : f32 to vector<1x384xf32>
    %6 = arith.subf %4, %5 : vector<1x384xf32>
    %7 = vector.extract_strided_slice %0 {offsets = [2, 0], sizes = [1, 384], strides = [1, 1]} : vector<4x384xf32> to vector<1x384xf32>
    %cst_2 = arith.constant 5.000000e-01 : f32
    %8 = vector.broadcast %cst_2 : f32 to vector<1x384xf32>
    %9 = arith.subf %7, %8 : vector<1x384xf32>
    %10 = vector.extract_strided_slice %0 {offsets = [3, 0], sizes = [1, 384], strides = [1, 1]} : vector<4x384xf32> to vector<1x384xf32>
    %cst_3 = arith.constant 5.000000e-01 : f32
    %11 = vector.broadcast %cst_3 : f32 to vector<1x384xf32>
    %12 = arith.subf %10, %11 : vector<1x384xf32>
    %13 = arith.addf %3, %9 : vector<1x384xf32>
    %14 = arith.addf %13, %6 : vector<1x384xf32>
    %15 = arith.addf %14, %12 : vector<1x384xf32>
    %cst_4 = arith.constant 0.000000e+00 : f32
    %16 = vector.broadcast %cst_4 : f32 to vector<1x384xf32>
    %17 = arith.subf %16, %3 : vector<1x384xf32>
    %18 = arith.subf %17, %9 : vector<1x384xf32>
    %19 = arith.addf %18, %6 : vector<1x384xf32>
    %20 = arith.addf %19, %12 : vector<1x384xf32>
    %cst_5 = arith.constant 0.000000e+00 : f32
    %21 = vector.broadcast %cst_5 : f32 to vector<1x384xf32>
    %22 = arith.subf %21, %3 : vector<1x384xf32>
    %23 = arith.addf %22, %9 : vector<1x384xf32>
    %24 = arith.subf %23, %6 : vector<1x384xf32>
    %25 = arith.addf %24, %12 : vector<1x384xf32>
    %26 = arith.subf %3, %9 : vector<1x384xf32>
    %27 = arith.subf %26, %6 : vector<1x384xf32>
    %28 = arith.addf %27, %12 : vector<1x384xf32>
    %29 = tpu.concatenate %15, %20, %25, %28 in 0 : vector<1x384xf32>, vector<1x384xf32>, vector<1x384xf32>, vector<1x384xf32> -> vector<4x384xf32>
    %c0_6 = arith.constant 0 : index
    %c0_7 = arith.constant 0 : index
    %30 = vector.load %arg2[%c0_6, %c0_7] : memref<4x384xf32, #tpu.memory_space<vmem>>, vector<4x384xf32>
    tpu.vector_store %arg2[%c0_6, %c0_7], %29 {strides = array<i32>} : memref<4x384xf32, #tpu.memory_space<vmem>>, vector<4x384xf32>,
    return
  }
  func.func @transform_0(%arg0: i32) -> (i32, i32) {
    %c0_i32 = arith.constant 0 : i32
    %c0_i32_0 = arith.constant 0 : i32
    return %c0_i32, %arg0 : i32, i32
  }
  func.func @transform_1(%arg0: i32) -> (i32, i32) {
    %c0_i32 = arith.constant 0 : i32
    %c0_i32_0 = arith.constant 0 : i32
    return %c0_i32, %arg0 : i32, i32
  }
}

module attributes {stable_mosaic.version = 11 : i64} {
  func.func @_hfrm_kernel(%arg0: i32, %arg1: i32, %arg2: memref<1x3x64xf32, #tpu.memory_space<vmem>>, %arg3: memref<64x3xf32, #tpu.memory_space<vmem>>, %arg4: memref<64x1xf32, #tpu.memory_space<vmem>>, %arg5: memref<3x64xf32, #tpu.memory_space<vmem>>, %arg6: memref<3x1xf32, #tpu.memory_space<vmem>>, %arg7: memref<1x3x64xf32, #tpu.memory_space<vmem>>) attributes {dimension_semantics = [#tpu.dimension_semantics<parallel>, #tpu.dimension_semantics<parallel>], iteration_bounds = array<i64: 6, 1>, scalar_prefetch = 0 : i64, scratch_operands = 0 : i64, tpu.core_type = #tpu.core_type<tc>, window_params = [{transform_indices = @transform_0, window_bounds = array<i64: 1, 3, 64>}, {pipeline_mode = #tpu.pipeline_mode<synchronous>, transform_indices = @transform_1, window_bounds = array<i64: 64, 3>}, {pipeline_mode = #tpu.pipeline_mode<synchronous>, transform_indices = @transform_2, window_bounds = array<i64: 64, 1>}, {pipeline_mode = #tpu.pipeline_mode<synchronous>, transform_indices = @transform_3, window_bounds = array<i64: 3, 64>}, {pipeline_mode = #tpu.pipeline_mode<synchronous>, transform_indices = @transform_4, window_bounds = array<i64: 3, 1>}, {transform_indices = @transform_5, window_bounds = array<i64: 1, 3, 64>}]} {
    %c0 = arith.constant 0 : index
    %c0_0 = arith.constant 0 : index
    %c0_1 = arith.constant 0 : index
    %0 = vector.load %arg2[%c0, %c0_0, %c0_1] : memref<1x3x64xf32, #tpu.memory_space<vmem>>, vector<1x3x64xf32>
    %1 = vector.shape_cast %0 : vector<1x3x64xf32> to vector<3x64xf32>
    %c0_2 = arith.constant 0 : index
    %c0_3 = arith.constant 0 : index
    %2 = vector.load %arg3[%c0_2, %c0_3] : memref<64x3xf32, #tpu.memory_space<vmem>>, vector<64x3xf32>
    %cst = arith.constant dense<0.000000e+00> : vector<64x64xf32>
    %3 = tpu.matmul %2, %1, %cst {dimension_numbers = #tpu.dot_dimension_numbers<[1], [0], [0], [1], [0, 0, 1, 1], [], []>} : vector<64x3xf32>, vector<3x64xf32>, vector<64x64xf32> -> vector<64x64xf32>
    %c0_4 = arith.constant 0 : index
    %c0_5 = arith.constant 0 : index
    %4 = vector.load %arg4[%c0_4, %c0_5] : memref<64x1xf32, #tpu.memory_space<vmem>>, vector<64x1xf32>
    %5 = vector.broadcast %4 : vector<64x1xf32> to vector<64x64xf32>
    %6 = arith.addf %3, %5 : vector<64x64xf32>
    %cst_6 = arith.constant 0.000000e+00 : f32
    %7 = vector.broadcast %cst_6 : f32 to vector<64x64xf32>
    %8 = arith.maximumf %6, %7 : vector<64x64xf32>
    %c0_7 = arith.constant 0 : index
    %c0_8 = arith.constant 0 : index
    %9 = vector.load %arg5[%c0_7, %c0_8] : memref<3x64xf32, #tpu.memory_space<vmem>>, vector<3x64xf32>
    %cst_9 = arith.constant dense<0.000000e+00> : vector<3x64xf32>
    %10 = tpu.matmul %9, %8, %cst_9 {dimension_numbers = #tpu.dot_dimension_numbers<[1], [0], [0], [1], [0, 0, 1, 1], [], []>} : vector<3x64xf32>, vector<64x64xf32>, vector<3x64xf32> -> vector<3x64xf32>
    %c0_10 = arith.constant 0 : index
    %c0_11 = arith.constant 0 : index
    %11 = vector.load %arg6[%c0_10, %c0_11] : memref<3x1xf32, #tpu.memory_space<vmem>>, vector<3x1xf32>
    %12 = vector.broadcast %11 : vector<3x1xf32> to vector<3x64xf32>
    %13 = arith.addf %10, %12 : vector<3x64xf32>
    %14 = arith.addf %13, %1 : vector<3x64xf32>
    %c0_12 = arith.constant 0 : index
    %c0_13 = arith.constant 0 : index
    %c0_14 = arith.constant 0 : index
    %15 = vector.load %arg7[%c0_12, %c0_13, %c0_14] : memref<1x3x64xf32, #tpu.memory_space<vmem>>, vector<1x3x64xf32>
    %16 = vector.shape_cast %15 : vector<1x3x64xf32> to vector<3x64xf32>
    %17 = vector.shape_cast %14 : vector<3x64xf32> to vector<1x3x64xf32>
    tpu.vector_store %arg7[%c0_12, %c0_13, %c0_14], %17 {strides = array<i32>} : memref<1x3x64xf32, #tpu.memory_space<vmem>>, vector<1x3x64xf32>,
    return
  }
  func.func @transform_0(%arg0: i32, %arg1: i32) -> (i32, i32, i32) {
    %c0_i32 = arith.constant 0 : i32
    %c0_i32_0 = arith.constant 0 : i32
    return %arg0, %c0_i32, %arg1 : i32, i32, i32
  }
  func.func @transform_1(%arg0: i32, %arg1: i32) -> (i32, i32) {
    %c0_i32 = arith.constant 0 : i32
    %c0_i32_0 = arith.constant 0 : i32
    %c0_i32_1 = arith.constant 0 : i32
    return %c0_i32, %c0_i32_0 : i32, i32
  }
  func.func @transform_2(%arg0: i32, %arg1: i32) -> (i32, i32) {
    %c0_i32 = arith.constant 0 : i32
    %c0_i32_0 = arith.constant 0 : i32
    %c0_i32_1 = arith.constant 0 : i32
    return %c0_i32, %c0_i32_0 : i32, i32
  }
  func.func @transform_3(%arg0: i32, %arg1: i32) -> (i32, i32) {
    %c0_i32 = arith.constant 0 : i32
    %c0_i32_0 = arith.constant 0 : i32
    %c0_i32_1 = arith.constant 0 : i32
    return %c0_i32, %c0_i32_0 : i32, i32
  }
  func.func @transform_4(%arg0: i32, %arg1: i32) -> (i32, i32) {
    %c0_i32 = arith.constant 0 : i32
    %c0_i32_0 = arith.constant 0 : i32
    %c0_i32_1 = arith.constant 0 : i32
    return %c0_i32, %c0_i32_0 : i32, i32
  }
  func.func @transform_5(%arg0: i32, %arg1: i32) -> (i32, i32, i32) {
    %c0_i32 = arith.constant 0 : i32
    %c0_i32_0 = arith.constant 0 : i32
    return %arg0, %c0_i32, %arg1 : i32, i32, i32
  }
}

module attributes {stable_mosaic.version = 11 : i64} {
  func.func @_dwt_kernel(%arg0: i32, %arg1: memref<4x96xf32, #tpu.memory_space<vmem>>, %arg2: memref<4x96xf32, #tpu.memory_space<vmem>>) attributes {dimension_semantics = [#tpu.dimension_semantics<parallel>], iteration_bounds = array<i64: 1>, scalar_prefetch = 0 : i64, scratch_operands = 0 : i64, tpu.core_type = #tpu.core_type<tc>, window_params = [{transform_indices = @transform_0, window_bounds = array<i64: 4, 96>}, {transform_indices = @transform_1, window_bounds = array<i64: 4, 96>}]} {
    %c0 = arith.constant 0 : index
    %c0_0 = arith.constant 0 : index
    %0 = vector.load %arg1[%c0, %c0_0] : memref<4x96xf32, #tpu.memory_space<vmem>>, vector<4x96xf32>
    %1 = vector.extract_strided_slice %0 {offsets = [0, 0], sizes = [1, 96], strides = [1, 1]} : vector<4x96xf32> to vector<1x96xf32>
    %cst = arith.constant 5.000000e-01 : f32
    %2 = vector.broadcast %cst : f32 to vector<1x96xf32>
    %3 = arith.mulf %1, %2 : vector<1x96xf32>
    %4 = vector.extract_strided_slice %0 {offsets = [1, 0], sizes = [1, 96], strides = [1, 1]} : vector<4x96xf32> to vector<1x96xf32>
    %cst_1 = arith.constant 5.000000e-01 : f32
    %5 = vector.broadcast %cst_1 : f32 to vector<1x96xf32>
    %6 = arith.mulf %4, %5 : vector<1x96xf32>
    %7 = vector.extract_strided_slice %0 {offsets = [2, 0], sizes = [1, 96], strides = [1, 1]} : vector<4x96xf32> to vector<1x96xf32>
    %cst_2 = arith.constant 5.000000e-01 : f32
    %8 = vector.broadcast %cst_2 : f32 to vector<1x96xf32>
    %9 = arith.mulf %7, %8 : vector<1x96xf32>
    %10 = vector.extract_strided_slice %0 {offsets = [3, 0], sizes = [1, 96], strides = [1, 1]} : vector<4x96xf32> to vector<1x96xf32>
    %cst_3 = arith.constant 5.000000e-01 : f32
    %11 = vector.broadcast %cst_3 : f32 to vector<1x96xf32>
    %12 = arith.mulf %10, %11 : vector<1x96xf32>
    %13 = arith.addf %3, %9 : vector<1x96xf32>
    %14 = arith.addf %13, %6 : vector<1x96xf32>
    %15 = arith.addf %14, %12 : vector<1x96xf32>
    %cst_4 = arith.constant 0.000000e+00 : f32
    %16 = vector.broadcast %cst_4 : f32 to vector<1x96xf32>
    %17 = arith.subf %16, %3 : vector<1x96xf32>
    %18 = arith.subf %17, %9 : vector<1x96xf32>
    %19 = arith.addf %18, %6 : vector<1x96xf32>
    %20 = arith.addf %19, %12 : vector<1x96xf32>
    %cst_5 = arith.constant 0.000000e+00 : f32
    %21 = vector.broadcast %cst_5 : f32 to vector<1x96xf32>
    %22 = arith.subf %21, %3 : vector<1x96xf32>
    %23 = arith.addf %22, %9 : vector<1x96xf32>
    %24 = arith.subf %23, %6 : vector<1x96xf32>
    %25 = arith.addf %24, %12 : vector<1x96xf32>
    %26 = arith.subf %3, %9 : vector<1x96xf32>
    %27 = arith.subf %26, %6 : vector<1x96xf32>
    %28 = arith.addf %27, %12 : vector<1x96xf32>
    %29 = tpu.concatenate %15, %20, %25, %28 in 0 : vector<1x96xf32>, vector<1x96xf32>, vector<1x96xf32>, vector<1x96xf32> -> vector<4x96xf32>
    %c0_6 = arith.constant 0 : index
    %c0_7 = arith.constant 0 : index
    %30 = vector.load %arg2[%c0_6, %c0_7] : memref<4x96xf32, #tpu.memory_space<vmem>>, vector<4x96xf32>
    tpu.vector_store %arg2[%c0_6, %c0_7], %29 {strides = array<i32>} : memref<4x96xf32, #tpu.memory_space<vmem>>, vector<4x96xf32>,
    return
  }
  func.func @transform_0(%arg0: i32) -> (i32, i32) {
    %c0_i32 = arith.constant 0 : i32
    %c0_i32_0 = arith.constant 0 : i32
    return %c0_i32, %arg0 : i32, i32
  }
  func.func @transform_1(%arg0: i32) -> (i32, i32) {
    %c0_i32 = arith.constant 0 : i32
    %c0_i32_0 = arith.constant 0 : i32
    return %c0_i32, %arg0 : i32, i32
  }
}

module attributes {stable_mosaic.version = 11 : i64} {
  func.func @_hfrm_kernel(%arg0: i32, %arg1: i32, %arg2: memref<1x3x16xf32, #tpu.memory_space<vmem>>, %arg3: memref<64x3xf32, #tpu.memory_space<vmem>>, %arg4: memref<64x1xf32, #tpu.memory_space<vmem>>, %arg5: memref<3x64xf32, #tpu.memory_space<vmem>>, %arg6: memref<3x1xf32, #tpu.memory_space<vmem>>, %arg7: memref<1x3x16xf32, #tpu.memory_space<vmem>>) attributes {dimension_semantics = [#tpu.dimension_semantics<parallel>, #tpu.dimension_semantics<parallel>], iteration_bounds = array<i64: 6, 1>, scalar_prefetch = 0 : i64, scratch_operands = 0 : i64, tpu.core_type = #tpu.core_type<tc>, window_params = [{transform_indices = @transform_0, window_bounds = array<i64: 1, 3, 16>}, {pipeline_mode = #tpu.pipeline_mode<synchronous>, transform_indices = @transform_1, window_bounds = array<i64: 64, 3>}, {pipeline_mode = #tpu.pipeline_mode<synchronous>, transform_indices = @transform_2, window_bounds = array<i64: 64, 1>}, {pipeline_mode = #tpu.pipeline_mode<synchronous>, transform_indices = @transform_3, window_bounds = array<i64: 3, 64>}, {pipeline_mode = #tpu.pipeline_mode<synchronous>, transform_indices = @transform_4, window_bounds = array<i64: 3, 1>}, {transform_indices = @transform_5, window_bounds = array<i64: 1, 3, 16>}]} {
    %c0 = arith.constant 0 : index
    %c0_0 = arith.constant 0 : index
    %c0_1 = arith.constant 0 : index
    %0 = vector.load %arg2[%c0, %c0_0, %c0_1] : memref<1x3x16xf32, #tpu.memory_space<vmem>>, vector<1x3x16xf32>
    %1 = vector.shape_cast %0 : vector<1x3x16xf32> to vector<3x16xf32>
    %c0_2 = arith.constant 0 : index
    %c0_3 = arith.constant 0 : index
    %2 = vector.load %arg3[%c0_2, %c0_3] : memref<64x3xf32, #tpu.memory_space<vmem>>, vector<64x3xf32>
    %cst = arith.constant dense<0.000000e+00> : vector<64x16xf32>
    %3 = tpu.matmul %2, %1, %cst {dimension_numbers = #tpu.dot_dimension_numbers<[1], [0], [0], [1], [0, 0, 1, 1], [], []>} : vector<64x3xf32>, vector<3x16xf32>, vector<64x16xf32> -> vector<64x16xf32>
    %c0_4 = arith.constant 0 : index
    %c0_5 = arith.constant 0 : index
    %4 = vector.load %arg4[%c0_4, %c0_5] : memref<64x1xf32, #tpu.memory_space<vmem>>, vector<64x1xf32>
    %5 = vector.broadcast %4 : vector<64x1xf32> to vector<64x16xf32>
    %6 = arith.addf %3, %5 : vector<64x16xf32>
    %cst_6 = arith.constant 0.000000e+00 : f32
    %7 = vector.broadcast %cst_6 : f32 to vector<64x16xf32>
    %8 = arith.maximumf %6, %7 : vector<64x16xf32>
    %c0_7 = arith.constant 0 : index
    %c0_8 = arith.constant 0 : index
    %9 = vector.load %arg5[%c0_7, %c0_8] : memref<3x64xf32, #tpu.memory_space<vmem>>, vector<3x64xf32>
    %cst_9 = arith.constant dense<0.000000e+00> : vector<3x16xf32>
    %10 = tpu.matmul %9, %8, %cst_9 {dimension_numbers = #tpu.dot_dimension_numbers<[1], [0], [0], [1], [0, 0, 1, 1], [], []>} : vector<3x64xf32>, vector<64x16xf32>, vector<3x16xf32> -> vector<3x16xf32>
    %c0_10 = arith.constant 0 : index
    %c0_11 = arith.constant 0 : index
    %11 = vector.load %arg6[%c0_10, %c0_11] : memref<3x1xf32, #tpu.memory_space<vmem>>, vector<3x1xf32>
    %12 = vector.broadcast %11 : vector<3x1xf32> to vector<3x16xf32>
    %13 = arith.addf %10, %12 : vector<3x16xf32>
    %14 = arith.addf %13, %1 : vector<3x16xf32>
    %c0_12 = arith.constant 0 : index
    %c0_13 = arith.constant 0 : index
    %c0_14 = arith.constant 0 : index
    %15 = vector.load %arg7[%c0_12, %c0_13, %c0_14] : memref<1x3x16xf32, #tpu.memory_space<vmem>>, vector<1x3x16xf32>
    %16 = vector.shape_cast %15 : vector<1x3x16xf32> to vector<3x16xf32>
    %17 = vector.shape_cast %14 : vector<3x16xf32> to vector<1x3x16xf32>
    tpu.vector_store %arg7[%c0_12, %c0_13, %c0_14], %17 {strides = array<i32>} : memref<1x3x16xf32, #tpu.memory_space<vmem>>, vector<1x3x16xf32>,
    return
  }
  func.func @transform_0(%arg0: i32, %arg1: i32) -> (i32, i32, i32) {
    %c0_i32 = arith.constant 0 : i32
    %c0_i32_0 = arith.constant 0 : i32
    return %arg0, %c0_i32, %arg1 : i32, i32, i32
  }
  func.func @transform_1(%arg0: i32, %arg1: i32) -> (i32, i32) {
    %c0_i32 = arith.constant 0 : i32
    %c0_i32_0 = arith.constant 0 : i32
    %c0_i32_1 = arith.constant 0 : i32
    return %c0_i32, %c0_i32_0 : i32, i32
  }
  func.func @transform_2(%arg0: i32, %arg1: i32) -> (i32, i32) {
    %c0_i32 = arith.constant 0 : i32
    %c0_i32_0 = arith.constant 0 : i32
    %c0_i32_1 = arith.constant 0 : i32
    return %c0_i32, %c0_i32_0 : i32, i32
  }
  func.func @transform_3(%arg0: i32, %arg1: i32) -> (i32, i32) {
    %c0_i32 = arith.constant 0 : i32
    %c0_i32_0 = arith.constant 0 : i32
    %c0_i32_1 = arith.constant 0 : i32
    return %c0_i32, %c0_i32_0 : i32, i32
  }
  func.func @transform_4(%arg0: i32, %arg1: i32) -> (i32, i32) {
    %c0_i32 = arith.constant 0 : i32
    %c0_i32_0 = arith.constant 0 : i32
    %c0_i32_1 = arith.constant 0 : i32
    return %c0_i32, %c0_i32_0 : i32, i32
  }
  func.func @transform_5(%arg0: i32, %arg1: i32) -> (i32, i32, i32) {
    %c0_i32 = arith.constant 0 : i32
    %c0_i32_0 = arith.constant 0 : i32
    return %arg0, %c0_i32, %arg1 : i32, i32, i32
  }
}

module attributes {stable_mosaic.version = 11 : i64} {
  func.func @_unet_sample_kernel(%arg0: i32, %arg1: i32, %arg2: memref<1x3x16xf32, #tpu.memory_space<vmem>>, %arg3: memref<1x3x16xf32, #tpu.memory_space<vmem>>, %arg4: memref<4x1x32xf32, #tpu.memory_space<vmem>>, %arg5: memref<32x32xf32, #tpu.memory_space<vmem>>, %arg6: memref<32x1xf32, #tpu.memory_space<vmem>>, %arg7: memref<32x3xf32, #tpu.memory_space<vmem>>, %arg8: memref<32x3xf32, #tpu.memory_space<vmem>>, %arg9: memref<32x1xf32, #tpu.memory_space<vmem>>, %arg10: memref<3x32xf32, #tpu.memory_space<vmem>>, %arg11: memref<3x1xf32, #tpu.memory_space<vmem>>, %arg12: memref<1x3x16xf32, #tpu.memory_space<vmem>>) attributes {dimension_semantics = [#tpu.dimension_semantics<parallel>, #tpu.dimension_semantics<parallel>], iteration_bounds = array<i64: 2, 1>, scalar_prefetch = 0 : i64, scratch_operands = 0 : i64, tpu.core_type = #tpu.core_type<tc>, window_params = [{transform_indices = @transform_0, window_bounds = array<i64: 1, 3, 16>}, {transform_indices = @transform_1, window_bounds = array<i64: 1, 3, 16>}, {pipeline_mode = #tpu.pipeline_mode<synchronous>, transform_indices = @transform_2, window_bounds = array<i64: 4, 1, 32>}, {pipeline_mode = #tpu.pipeline_mode<synchronous>, transform_indices = @transform_3, window_bounds = array<i64: 32, 32>}, {pipeline_mode = #tpu.pipeline_mode<synchronous>, transform_indices = @transform_4, window_bounds = array<i64: 32, 1>}, {pipeline_mode = #tpu.pipeline_mode<synchronous>, transform_indices = @transform_5, window_bounds = array<i64: 32, 3>}, {pipeline_mode = #tpu.pipeline_mode<synchronous>, transform_indices = @transform_6, window_bounds = array<i64: 32, 3>}, {pipeline_mode = #tpu.pipeline_mode<synchronous>, transform_indices = @transform_7, window_bounds = array<i64: 32, 1>}, {pipeline_mode = #tpu.pipeline_mode<synchronous>, transform_indices = @transform_8, window_bounds = array<i64: 3, 32>}, {pipeline_mode = #tpu.pipeline_mode<synchronous>, transform_indices = @transform_9, window_bounds = array<i64: 3, 1>}, {transform_indices = @transform_10, window_bounds = array<i64: 1, 3, 16>}]} {
    %c0 = arith.constant 0 : index
    %c0_0 = arith.constant 0 : index
    %c0_1 = arith.constant 0 : index
    %0 = vector.load %arg2[%c0, %c0_0, %c0_1] : memref<1x3x16xf32, #tpu.memory_space<vmem>>, vector<1x3x16xf32>
    %1 = vector.shape_cast %0 : vector<1x3x16xf32> to vector<3x16xf32>
    %c0_2 = arith.constant 0 : index
    %c0_3 = arith.constant 0 : index
    %c0_4 = arith.constant 0 : index
    %2 = vector.load %arg3[%c0_2, %c0_3, %c0_4] : memref<1x3x16xf32, #tpu.memory_space<vmem>>, vector<1x3x16xf32>
    %3 = vector.shape_cast %2 : vector<1x3x16xf32> to vector<3x16xf32>
    %c0_5 = arith.constant 0 : index
    %c0_6 = arith.constant 0 : index
    %4 = vector.load %arg7[%c0_5, %c0_6] : memref<32x3xf32, #tpu.memory_space<vmem>>, vector<32x3xf32>
    %cst = arith.constant dense<0.000000e+00> : vector<32x16xf32>
    %5 = tpu.matmul %4, %1, %cst {dimension_numbers = #tpu.dot_dimension_numbers<[1], [0], [0], [1], [0, 0, 1, 1], [], []>} : vector<32x3xf32>, vector<3x16xf32>, vector<32x16xf32> -> vector<32x16xf32>
    %c0_7 = arith.constant 0 : index
    %c0_8 = arith.constant 0 : index
    %c0_9 = arith.constant 0 : index
    %6 = vector.load %arg4[%c0_7, %c0_8, %c0_9] : memref<4x1x32xf32, #tpu.memory_space<vmem>>, vector<1x1x32xf32>
    %7 = vector.shape_cast %6 : vector<1x1x32xf32> to vector<1x32xf32>
    %c0_10 = arith.constant 0 : index
    %c0_11 = arith.constant 0 : index
    %8 = vector.load %arg5[%c0_10, %c0_11] : memref<32x32xf32, #tpu.memory_space<vmem>>, vector<32x32xf32>
    %9 = vector.broadcast %7 : vector<1x32xf32> to vector<32x32xf32>
    %10 = arith.mulf %8, %9 : vector<32x32xf32>
    %cst_12 = arith.constant dense<0.000000e+00> : vector<32xf32>
    %11 = vector.multi_reduction <add>, %10, %cst_12 [1] : vector<32x32xf32> to vector<32xf32>
    %12 = vector.shape_cast %11 : vector<32xf32> to vector<32x1xf32>
    %c0_13 = arith.constant 0 : index
    %c0_14 = arith.constant 0 : index
    %13 = vector.load %arg6[%c0_13, %c0_14] : memref<32x1xf32, #tpu.memory_space<vmem>>, vector<32x1xf32>
    %14 = arith.addf %12, %13 : vector<32x1xf32>
    %cst_15 = arith.constant 0.000000e+00 : f32
    %15 = vector.broadcast %cst_15 : f32 to vector<32x1xf32>
    %16 = arith.maximumf %14, %15 : vector<32x1xf32>
    %c0_16 = arith.constant 0 : index
    %c0_17 = arith.constant 0 : index
    %17 = vector.load %arg8[%c0_16, %c0_17] : memref<32x3xf32, #tpu.memory_space<vmem>>, vector<32x3xf32>
    %cst_18 = arith.constant dense<0.000000e+00> : vector<32x16xf32>
    %18 = tpu.matmul %17, %3, %cst_18 {dimension_numbers = #tpu.dot_dimension_numbers<[1], [0], [0], [1], [0, 0, 1, 1], [], []>} : vector<32x3xf32>, vector<3x16xf32>, vector<32x16xf32> -> vector<32x16xf32>
    %19 = arith.addf %5, %18 : vector<32x16xf32>
    %20 = vector.broadcast %16 : vector<32x1xf32> to vector<32x16xf32>
    %21 = arith.addf %19, %20 : vector<32x16xf32>
    %c0_19 = arith.constant 0 : index
    %c0_20 = arith.constant 0 : index
    %22 = vector.load %arg9[%c0_19, %c0_20] : memref<32x1xf32, #tpu.memory_space<vmem>>, vector<32x1xf32>
    %23 = vector.broadcast %22 : vector<32x1xf32> to vector<32x16xf32>
    %24 = arith.addf %21, %23 : vector<32x16xf32>
    %cst_21 = arith.constant 0.000000e+00 : f32
    %25 = vector.broadcast %cst_21 : f32 to vector<32x16xf32>
    %26 = arith.maximumf %24, %25 : vector<32x16xf32>
    %c0_22 = arith.constant 0 : index
    %c0_23 = arith.constant 0 : index
    %27 = vector.load %arg10[%c0_22, %c0_23] : memref<3x32xf32, #tpu.memory_space<vmem>>, vector<3x32xf32>
    %cst_24 = arith.constant dense<0.000000e+00> : vector<3x16xf32>
    %28 = tpu.matmul %27, %26, %cst_24 {dimension_numbers = #tpu.dot_dimension_numbers<[1], [0], [0], [1], [0, 0, 1, 1], [], []>} : vector<3x32xf32>, vector<32x16xf32>, vector<3x16xf32> -> vector<3x16xf32>
    %c0_25 = arith.constant 0 : index
    %c0_26 = arith.constant 0 : index
    %29 = vector.load %arg11[%c0_25, %c0_26] : memref<3x1xf32, #tpu.memory_space<vmem>>, vector<3x1xf32>
    %30 = vector.broadcast %29 : vector<3x1xf32> to vector<3x16xf32>
    %31 = arith.addf %28, %30 : vector<3x16xf32>
    %cst_27 = arith.constant 0.346599758 : f32
    %32 = vector.broadcast %cst_27 : f32 to vector<3x16xf32>
    %33 = arith.mulf %31, %32 : vector<3x16xf32>
    %34 = arith.subf %3, %33 : vector<3x16xf32>
    %cst_28 = arith.constant 1.06608319 : f32
    %35 = vector.broadcast %cst_28 : f32 to vector<3x16xf32>
    %36 = arith.mulf %34, %35 : vector<3x16xf32>
    %cst_29 = arith.constant 9.709680e-01 : f32
    %37 = vector.broadcast %cst_29 : f32 to vector<3x16xf32>
    %38 = arith.mulf %37, %36 : vector<3x16xf32>
    %cst_30 = arith.constant 0.239209265 : f32
    %39 = vector.broadcast %cst_30 : f32 to vector<3x16xf32>
    %40 = arith.mulf %39, %31 : vector<3x16xf32>
    %41 = arith.addf %38, %40 : vector<3x16xf32>
    %c1 = arith.constant 1 : index
    %c0_31 = arith.constant 0 : index
    %c0_32 = arith.constant 0 : index
    %42 = vector.load %arg4[%c1, %c0_31, %c0_32] : memref<4x1x32xf32, #tpu.memory_space<vmem>>, vector<1x1x32xf32>
    %43 = vector.shape_cast %42 : vector<1x1x32xf32> to vector<1x32xf32>
    %c0_33 = arith.constant 0 : index
    %c0_34 = arith.constant 0 : index
    %44 = vector.load %arg5[%c0_33, %c0_34] : memref<32x32xf32, #tpu.memory_space<vmem>>, vector<32x32xf32>
    %45 = vector.broadcast %43 : vector<1x32xf32> to vector<32x32xf32>
    %46 = arith.mulf %44, %45 : vector<32x32xf32>
    %cst_35 = arith.constant dense<0.000000e+00> : vector<32xf32>
    %47 = vector.multi_reduction <add>, %46, %cst_35 [1] : vector<32x32xf32> to vector<32xf32>
    %48 = vector.shape_cast %47 : vector<32xf32> to vector<32x1xf32>
    %c0_36 = arith.constant 0 : index
    %c0_37 = arith.constant 0 : index
    %49 = vector.load %arg6[%c0_36, %c0_37] : memref<32x1xf32, #tpu.memory_space<vmem>>, vector<32x1xf32>
    %50 = arith.addf %48, %49 : vector<32x1xf32>
    %cst_38 = arith.constant 0.000000e+00 : f32
    %51 = vector.broadcast %cst_38 : f32 to vector<32x1xf32>
    %52 = arith.maximumf %50, %51 : vector<32x1xf32>
    %c0_39 = arith.constant 0 : index
    %c0_40 = arith.constant 0 : index
    %53 = vector.load %arg8[%c0_39, %c0_40] : memref<32x3xf32, #tpu.memory_space<vmem>>, vector<32x3xf32>
    %cst_41 = arith.constant dense<0.000000e+00> : vector<32x16xf32>
    %54 = tpu.matmul %53, %41, %cst_41 {dimension_numbers = #tpu.dot_dimension_numbers<[1], [0], [0], [1], [0, 0, 1, 1], [], []>} : vector<32x3xf32>, vector<3x16xf32>, vector<32x16xf32> -> vector<32x16xf32>
    %55 = arith.addf %5, %54 : vector<32x16xf32>
    %56 = vector.broadcast %52 : vector<32x1xf32> to vector<32x16xf32>
    %57 = arith.addf %55, %56 : vector<32x16xf32>
    %c0_42 = arith.constant 0 : index
    %c0_43 = arith.constant 0 : index
    %58 = vector.load %arg9[%c0_42, %c0_43] : memref<32x1xf32, #tpu.memory_space<vmem>>, vector<32x1xf32>
    %59 = vector.broadcast %58 : vector<32x1xf32> to vector<32x16xf32>
    %60 = arith.addf %57, %59 : vector<32x16xf32>
    %cst_44 = arith.constant 0.000000e+00 : f32
    %61 = vector.broadcast %cst_44 : f32 to vector<32x16xf32>
    %62 = arith.maximumf %60, %61 : vector<32x16xf32>
    %c0_45 = arith.constant 0 : index
    %c0_46 = arith.constant 0 : index
    %63 = vector.load %arg10[%c0_45, %c0_46] : memref<3x32xf32, #tpu.memory_space<vmem>>, vector<3x32xf32>
    %cst_47 = arith.constant dense<0.000000e+00> : vector<3x16xf32>
    %64 = tpu.matmul %63, %62, %cst_47 {dimension_numbers = #tpu.dot_dimension_numbers<[1], [0], [0], [1], [0, 0, 1, 1], [], []>} : vector<3x32xf32>, vector<32x16xf32>, vector<3x16xf32> -> vector<3x16xf32>
    %c0_48 = arith.constant 0 : index
    %c0_49 = arith.constant 0 : index
    %65 = vector.load %arg11[%c0_48, %c0_49] : memref<3x1xf32, #tpu.memory_space<vmem>>, vector<3x1xf32>
    %66 = vector.broadcast %65 : vector<3x1xf32> to vector<3x16xf32>
    %67 = arith.addf %64, %66 : vector<3x16xf32>
    %cst_50 = arith.constant 0.239209265 : f32
    %68 = vector.broadcast %cst_50 : f32 to vector<3x16xf32>
    %69 = arith.mulf %67, %68 : vector<3x16xf32>
    %70 = arith.subf %41, %69 : vector<3x16xf32>
    %cst_51 = arith.constant 1.02990007 : f32
    %71 = vector.broadcast %cst_51 : f32 to vector<3x16xf32>
    %72 = arith.mulf %70, %71 : vector<3x16xf32>
    %cst_52 = arith.constant 0.991862118 : f32
    %73 = vector.broadcast %cst_52 : f32 to vector<3x16xf32>
    %74 = arith.mulf %73, %72 : vector<3x16xf32>
    %cst_53 = arith.constant 0.127316833 : f32
    %75 = vector.broadcast %cst_53 : f32 to vector<3x16xf32>
    %76 = arith.mulf %75, %67 : vector<3x16xf32>
    %77 = arith.addf %74, %76 : vector<3x16xf32>
    %c2 = arith.constant 2 : index
    %c0_54 = arith.constant 0 : index
    %c0_55 = arith.constant 0 : index
    %78 = vector.load %arg4[%c2, %c0_54, %c0_55] : memref<4x1x32xf32, #tpu.memory_space<vmem>>, vector<1x1x32xf32>
    %79 = vector.shape_cast %78 : vector<1x1x32xf32> to vector<1x32xf32>
    %c0_56 = arith.constant 0 : index
    %c0_57 = arith.constant 0 : index
    %80 = vector.load %arg5[%c0_56, %c0_57] : memref<32x32xf32, #tpu.memory_space<vmem>>, vector<32x32xf32>
    %81 = vector.broadcast %79 : vector<1x32xf32> to vector<32x32xf32>
    %82 = arith.mulf %80, %81 : vector<32x32xf32>
    %cst_58 = arith.constant dense<0.000000e+00> : vector<32xf32>
    %83 = vector.multi_reduction <add>, %82, %cst_58 [1] : vector<32x32xf32> to vector<32xf32>
    %84 = vector.shape_cast %83 : vector<32xf32> to vector<32x1xf32>
    %c0_59 = arith.constant 0 : index
    %c0_60 = arith.constant 0 : index
    %85 = vector.load %arg6[%c0_59, %c0_60] : memref<32x1xf32, #tpu.memory_space<vmem>>, vector<32x1xf32>
    %86 = arith.addf %84, %85 : vector<32x1xf32>
    %cst_61 = arith.constant 0.000000e+00 : f32
    %87 = vector.broadcast %cst_61 : f32 to vector<32x1xf32>
    %88 = arith.maximumf %86, %87 : vector<32x1xf32>
    %c0_62 = arith.constant 0 : index
    %c0_63 = arith.constant 0 : index
    %89 = vector.load %arg8[%c0_62, %c0_63] : memref<32x3xf32, #tpu.memory_space<vmem>>, vector<32x3xf32>
    %cst_64 = arith.constant dense<0.000000e+00> : vector<32x16xf32>
    %90 = tpu.matmul %89, %77, %cst_64 {dimension_numbers = #tpu.dot_dimension_numbers<[1], [0], [0], [1], [0, 0, 1, 1], [], []>} : vector<32x3xf32>, vector<3x16xf32>, vector<32x16xf32> -> vector<32x16xf32>
    %91 = arith.addf %5, %90 : vector<32x16xf32>
    %92 = vector.broadcast %88 : vector<32x1xf32> to vector<32x16xf32>
    %93 = arith.addf %91, %92 : vector<32x16xf32>
    %c0_65 = arith.constant 0 : index
    %c0_66 = arith.constant 0 : index
    %94 = vector.load %arg9[%c0_65, %c0_66] : memref<32x1xf32, #tpu.memory_space<vmem>>, vector<32x1xf32>
    %95 = vector.broadcast %94 : vector<32x1xf32> to vector<32x16xf32>
    %96 = arith.addf %93, %95 : vector<32x16xf32>
    %cst_67 = arith.constant 0.000000e+00 : f32
    %97 = vector.broadcast %cst_67 : f32 to vector<32x16xf32>
    %98 = arith.maximumf %96, %97 : vector<32x16xf32>
    %c0_68 = arith.constant 0 : index
    %c0_69 = arith.constant 0 : index
    %99 = vector.load %arg10[%c0_68, %c0_69] : memref<3x32xf32, #tpu.memory_space<vmem>>, vector<3x32xf32>
    %cst_70 = arith.constant dense<0.000000e+00> : vector<3x16xf32>
    %100 = tpu.matmul %99, %98, %cst_70 {dimension_numbers = #tpu.dot_dimension_numbers<[1], [0], [0], [1], [0, 0, 1, 1], [], []>} : vector<3x32xf32>, vector<32x16xf32>, vector<3x16xf32> -> vector<3x16xf32>
    %c0_71 = arith.constant 0 : index
    %c0_72 = arith.constant 0 : index
    %101 = vector.load %arg11[%c0_71, %c0_72] : memref<3x1xf32, #tpu.memory_space<vmem>>, vector<3x1xf32>
    %102 = vector.broadcast %101 : vector<3x1xf32> to vector<3x16xf32>
    %103 = arith.addf %100, %102 : vector<3x16xf32>
    %cst_73 = arith.constant 0.127316833 : f32
    %104 = vector.broadcast %cst_73 : f32 to vector<3x16xf32>
    %105 = arith.mulf %103, %104 : vector<3x16xf32>
    %106 = arith.subf %77, %105 : vector<3x16xf32>
    %cst_74 = arith.constant 1.0082047 : f32
    %107 = vector.broadcast %cst_74 : f32 to vector<3x16xf32>
    %108 = arith.mulf %106, %107 : vector<3x16xf32>
    %cst_75 = arith.constant 0.999949991 : f32
    %109 = vector.broadcast %cst_75 : f32 to vector<3x16xf32>
    %110 = arith.mulf %109, %108 : vector<3x16xf32>
    %cst_76 = arith.constant 0.00999999977 : f32
    %111 = vector.broadcast %cst_76 : f32 to vector<3x16xf32>
    %112 = arith.mulf %111, %103 : vector<3x16xf32>
    %113 = arith.addf %110, %112 : vector<3x16xf32>
    %c3 = arith.constant 3 : index
    %c0_77 = arith.constant 0 : index
    %c0_78 = arith.constant 0 : index
    %114 = vector.load %arg4[%c3, %c0_77, %c0_78] : memref<4x1x32xf32, #tpu.memory_space<vmem>>, vector<1x1x32xf32>
    %115 = vector.shape_cast %114 : vector<1x1x32xf32> to vector<1x32xf32>
    %c0_79 = arith.constant 0 : index
    %c0_80 = arith.constant 0 : index
    %116 = vector.load %arg5[%c0_79, %c0_80] : memref<32x32xf32, #tpu.memory_space<vmem>>, vector<32x32xf32>
    %117 = vector.broadcast %115 : vector<1x32xf32> to vector<32x32xf32>
    %118 = arith.mulf %116, %117 : vector<32x32xf32>
    %cst_81 = arith.constant dense<0.000000e+00> : vector<32xf32>
    %119 = vector.multi_reduction <add>, %118, %cst_81 [1] : vector<32x32xf32> to vector<32xf32>
    %120 = vector.shape_cast %119 : vector<32xf32> to vector<32x1xf32>
    %c0_82 = arith.constant 0 : index
    %c0_83 = arith.constant 0 : index
    %121 = vector.load %arg6[%c0_82, %c0_83] : memref<32x1xf32, #tpu.memory_space<vmem>>, vector<32x1xf32>
    %122 = arith.addf %120, %121 : vector<32x1xf32>
    %cst_84 = arith.constant 0.000000e+00 : f32
    %123 = vector.broadcast %cst_84 : f32 to vector<32x1xf32>
    %124 = arith.maximumf %122, %123 : vector<32x1xf32>
    %c0_85 = arith.constant 0 : index
    %c0_86 = arith.constant 0 : index
    %125 = vector.load %arg8[%c0_85, %c0_86] : memref<32x3xf32, #tpu.memory_space<vmem>>, vector<32x3xf32>
    %cst_87 = arith.constant dense<0.000000e+00> : vector<32x16xf32>
    %126 = tpu.matmul %125, %113, %cst_87 {dimension_numbers = #tpu.dot_dimension_numbers<[1], [0], [0], [1], [0, 0, 1, 1], [], []>} : vector<32x3xf32>, vector<3x16xf32>, vector<32x16xf32> -> vector<32x16xf32>
    %127 = arith.addf %5, %126 : vector<32x16xf32>
    %128 = vector.broadcast %124 : vector<32x1xf32> to vector<32x16xf32>
    %129 = arith.addf %127, %128 : vector<32x16xf32>
    %c0_88 = arith.constant 0 : index
    %c0_89 = arith.constant 0 : index
    %130 = vector.load %arg9[%c0_88, %c0_89] : memref<32x1xf32, #tpu.memory_space<vmem>>, vector<32x1xf32>
    %131 = vector.broadcast %130 : vector<32x1xf32> to vector<32x16xf32>
    %132 = arith.addf %129, %131 : vector<32x16xf32>
    %cst_90 = arith.constant 0.000000e+00 : f32
    %133 = vector.broadcast %cst_90 : f32 to vector<32x16xf32>
    %134 = arith.maximumf %132, %133 : vector<32x16xf32>
    %c0_91 = arith.constant 0 : index
    %c0_92 = arith.constant 0 : index
    %135 = vector.load %arg10[%c0_91, %c0_92] : memref<3x32xf32, #tpu.memory_space<vmem>>, vector<3x32xf32>
    %cst_93 = arith.constant dense<0.000000e+00> : vector<3x16xf32>
    %136 = tpu.matmul %135, %134, %cst_93 {dimension_numbers = #tpu.dot_dimension_numbers<[1], [0], [0], [1], [0, 0, 1, 1], [], []>} : vector<3x32xf32>, vector<32x16xf32>, vector<3x16xf32> -> vector<3x16xf32>
    %c0_94 = arith.constant 0 : index
    %c0_95 = arith.constant 0 : index
    %137 = vector.load %arg11[%c0_94, %c0_95] : memref<3x1xf32, #tpu.memory_space<vmem>>, vector<3x1xf32>
    %138 = vector.broadcast %137 : vector<3x1xf32> to vector<3x16xf32>
    %139 = arith.addf %136, %138 : vector<3x16xf32>
    %cst_96 = arith.constant 0.00999999977 : f32
    %140 = vector.broadcast %cst_96 : f32 to vector<3x16xf32>
    %141 = arith.mulf %139, %140 : vector<3x16xf32>
    %142 = arith.subf %113, %141 : vector<3x16xf32>
    %cst_97 = arith.constant 1.000050e+00 : f32
    %143 = vector.broadcast %cst_97 : f32 to vector<3x16xf32>
    %144 = arith.mulf %142, %143 : vector<3x16xf32>
    %cst_98 = arith.constant 1.000000e+00 : f32
    %145 = vector.broadcast %cst_98 : f32 to vector<3x16xf32>
    %146 = arith.mulf %145, %144 : vector<3x16xf32>
    %cst_99 = arith.constant 0.000000e+00 : f32
    %147 = vector.broadcast %cst_99 : f32 to vector<3x16xf32>
    %148 = arith.mulf %147, %139 : vector<3x16xf32>
    %149 = arith.addf %146, %148 : vector<3x16xf32>
    %c0_100 = arith.constant 0 : index
    %c0_101 = arith.constant 0 : index
    %c0_102 = arith.constant 0 : index
    %150 = vector.load %arg12[%c0_100, %c0_101, %c0_102] : memref<1x3x16xf32, #tpu.memory_space<vmem>>, vector<1x3x16xf32>
    %151 = vector.shape_cast %150 : vector<1x3x16xf32> to vector<3x16xf32>
    %152 = vector.shape_cast %149 : vector<3x16xf32> to vector<1x3x16xf32>
    tpu.vector_store %arg12[%c0_100, %c0_101, %c0_102], %152 {strides = array<i32>} : memref<1x3x16xf32, #tpu.memory_space<vmem>>, vector<1x3x16xf32>,
    return
  }
  func.func @transform_0(%arg0: i32, %arg1: i32) -> (i32, i32, i32) {
    %c0_i32 = arith.constant 0 : i32
    %c0_i32_0 = arith.constant 0 : i32
    return %arg0, %c0_i32, %arg1 : i32, i32, i32
  }
  func.func @transform_1(%arg0: i32, %arg1: i32) -> (i32, i32, i32) {
    %c0_i32 = arith.constant 0 : i32
    %c0_i32_0 = arith.constant 0 : i32
    return %arg0, %c0_i32, %arg1 : i32, i32, i32
  }
  func.func @transform_2(%arg0: i32, %arg1: i32) -> (i32, i32, i32) {
    %c0_i32 = arith.constant 0 : i32
    %c0_i32_0 = arith.constant 0 : i32
    %c0_i32_1 = arith.constant 0 : i32
    %c0_i32_2 = arith.constant 0 : i32
    return %c0_i32, %c0_i32_0, %c0_i32_1 : i32, i32, i32
  }
  func.func @transform_3(%arg0: i32, %arg1: i32) -> (i32, i32) {
    %c0_i32 = arith.constant 0 : i32
    %c0_i32_0 = arith.constant 0 : i32
    %c0_i32_1 = arith.constant 0 : i32
    return %c0_i32, %c0_i32_0 : i32, i32
  }
  func.func @transform_4(%arg0: i32, %arg1: i32) -> (i32, i32) {
    %c0_i32 = arith.constant 0 : i32
    %c0_i32_0 = arith.constant 0 : i32
    %c0_i32_1 = arith.constant 0 : i32
    return %c0_i32, %c0_i32_0 : i32, i32
  }
  func.func @transform_5(%arg0: i32, %arg1: i32) -> (i32, i32) {
    %c0_i32 = arith.constant 0 : i32
    %c0_i32_0 = arith.constant 0 : i32
    %c0_i32_1 = arith.constant 0 : i32
    return %c0_i32, %c0_i32_0 : i32, i32
  }
  func.func @transform_6(%arg0: i32, %arg1: i32) -> (i32, i32) {
    %c0_i32 = arith.constant 0 : i32
    %c0_i32_0 = arith.constant 0 : i32
    %c0_i32_1 = arith.constant 0 : i32
    return %c0_i32, %c0_i32_0 : i32, i32
  }
  func.func @transform_7(%arg0: i32, %arg1: i32) -> (i32, i32) {
    %c0_i32 = arith.constant 0 : i32
    %c0_i32_0 = arith.constant 0 : i32
    %c0_i32_1 = arith.constant 0 : i32
    return %c0_i32, %c0_i32_0 : i32, i32
  }
  func.func @transform_8(%arg0: i32, %arg1: i32) -> (i32, i32) {
    %c0_i32 = arith.constant 0 : i32
    %c0_i32_0 = arith.constant 0 : i32
    %c0_i32_1 = arith.constant 0 : i32
    return %c0_i32, %c0_i32_0 : i32, i32
  }
  func.func @transform_9(%arg0: i32, %arg1: i32) -> (i32, i32) {
    %c0_i32 = arith.constant 0 : i32
    %c0_i32_0 = arith.constant 0 : i32
    %c0_i32_1 = arith.constant 0 : i32
    return %c0_i32, %c0_i32_0 : i32, i32
  }
  func.func @transform_10(%arg0: i32, %arg1: i32) -> (i32, i32, i32) {
    %c0_i32 = arith.constant 0 : i32
    %c0_i32_0 = arith.constant 0 : i32
    return %arg0, %c0_i32, %arg1 : i32, i32, i32
  }
}

module attributes {stable_mosaic.version = 11 : i64} {
  func.func @_iwt_kernel(%arg0: i32, %arg1: memref<4x96xf32, #tpu.memory_space<vmem>>, %arg2: memref<4x96xf32, #tpu.memory_space<vmem>>) attributes {dimension_semantics = [#tpu.dimension_semantics<parallel>], iteration_bounds = array<i64: 1>, scalar_prefetch = 0 : i64, scratch_operands = 0 : i64, tpu.core_type = #tpu.core_type<tc>, window_params = [{transform_indices = @transform_0, window_bounds = array<i64: 4, 96>}, {transform_indices = @transform_1, window_bounds = array<i64: 4, 96>}]} {
    %c0 = arith.constant 0 : index
    %c0_0 = arith.constant 0 : index
    %0 = vector.load %arg1[%c0, %c0_0] : memref<4x96xf32, #tpu.memory_space<vmem>>, vector<4x96xf32>
    %1 = vector.extract_strided_slice %0 {offsets = [0, 0], sizes = [1, 96], strides = [1, 1]} : vector<4x96xf32> to vector<1x96xf32>
    %cst = arith.constant 5.000000e-01 : f32
    %2 = vector.broadcast %cst : f32 to vector<1x96xf32>
    %3 = arith.mulf %1, %2 : vector<1x96xf32>
    %4 = vector.extract_strided_slice %0 {offsets = [1, 0], sizes = [1, 96], strides = [1, 1]} : vector<4x96xf32> to vector<1x96xf32>
    %cst_1 = arith.constant 5.000000e-01 : f32
    %5 = vector.broadcast %cst_1 : f32 to vector<1x96xf32>
    %6 = arith.mulf %4, %5 : vector<1x96xf32>
    %7 = vector.extract_strided_slice %0 {offsets = [2, 0], sizes = [1, 96], strides = [1, 1]} : vector<4x96xf32> to vector<1x96xf32>
    %cst_2 = arith.constant 5.000000e-01 : f32
    %8 = vector.broadcast %cst_2 : f32 to vector<1x96xf32>
    %9 = arith.mulf %7, %8 : vector<1x96xf32>
    %10 = vector.extract_strided_slice %0 {offsets = [3, 0], sizes = [1, 96], strides = [1, 1]} : vector<4x96xf32> to vector<1x96xf32>
    %cst_3 = arith.constant 5.000000e-01 : f32
    %11 = vector.broadcast %cst_3 : f32 to vector<1x96xf32>
    %12 = arith.mulf %10, %11 : vector<1x96xf32>
    %13 = arith.subf %3, %6 : vector<1x96xf32>
    %14 = arith.subf %13, %9 : vector<1x96xf32>
    %15 = arith.addf %14, %12 : vector<1x96xf32>
    %16 = arith.addf %3, %6 : vector<1x96xf32>
    %17 = arith.subf %16, %9 : vector<1x96xf32>
    %18 = arith.subf %17, %12 : vector<1x96xf32>
    %19 = arith.subf %3, %6 : vector<1x96xf32>
    %20 = arith.addf %19, %9 : vector<1x96xf32>
    %21 = arith.subf %20, %12 : vector<1x96xf32>
    %22 = arith.addf %3, %6 : vector<1x96xf32>
    %23 = arith.addf %22, %9 : vector<1x96xf32>
    %24 = arith.addf %23, %12 : vector<1x96xf32>
    %25 = tpu.concatenate %15, %18, %21, %24 in 0 : vector<1x96xf32>, vector<1x96xf32>, vector<1x96xf32>, vector<1x96xf32> -> vector<4x96xf32>
    %c0_4 = arith.constant 0 : index
    %c0_5 = arith.constant 0 : index
    %26 = vector.load %arg2[%c0_4, %c0_5] : memref<4x96xf32, #tpu.memory_space<vmem>>, vector<4x96xf32>
    tpu.vector_store %arg2[%c0_4, %c0_5], %25 {strides = array<i32>} : memref<4x96xf32, #tpu.memory_space<vmem>>, vector<4x96xf32>,
    return
  }
  func.func @transform_0(%arg0: i32) -> (i32, i32) {
    %c0_i32 = arith.constant 0 : i32
    %c0_i32_0 = arith.constant 0 : i32
    return %c0_i32, %arg0 : i32, i32
  }
  func.func @transform_1(%arg0: i32) -> (i32, i32) {
    %c0_i32 = arith.constant 0 : i32
    %c0_i32_0 = arith.constant 0 : i32
    return %c0_i32, %arg0 : i32, i32
  }
}

module attributes {stable_mosaic.version = 11 : i64} {
  func.func @_iwt_kernel(%arg0: i32, %arg1: memref<4x384xf32, #tpu.memory_space<vmem>>, %arg2: memref<4x384xf32, #tpu.memory_space<vmem>>) attributes {dimension_semantics = [#tpu.dimension_semantics<parallel>], iteration_bounds = array<i64: 1>, scalar_prefetch = 0 : i64, scratch_operands = 0 : i64, tpu.core_type = #tpu.core_type<tc>, window_params = [{transform_indices = @transform_0, window_bounds = array<i64: 4, 384>}, {transform_indices = @transform_1, window_bounds = array<i64: 4, 384>}]} {
    %c0 = arith.constant 0 : index
    %c0_0 = arith.constant 0 : index
    %0 = vector.load %arg1[%c0, %c0_0] : memref<4x384xf32, #tpu.memory_space<vmem>>, vector<4x384xf32>
    %1 = vector.extract_strided_slice %0 {offsets = [0, 0], sizes = [1, 384], strides = [1, 1]} : vector<4x384xf32> to vector<1x384xf32>
    %cst = arith.constant 5.000000e-01 : f32
    %2 = vector.broadcast %cst : f32 to vector<1x384xf32>
    %3 = arith.mulf %1, %2 : vector<1x384xf32>
    %4 = vector.extract_strided_slice %0 {offsets = [1, 0], sizes = [1, 384], strides = [1, 1]} : vector<4x384xf32> to vector<1x384xf32>
    %cst_1 = arith.constant 5.000000e-01 : f32
    %5 = vector.broadcast %cst_1 : f32 to vector<1x384xf32>
    %6 = arith.mulf %4, %5 : vector<1x384xf32>
    %7 = vector.extract_strided_slice %0 {offsets = [2, 0], sizes = [1, 384], strides = [1, 1]} : vector<4x384xf32> to vector<1x384xf32>
    %cst_2 = arith.constant 5.000000e-01 : f32
    %8 = vector.broadcast %cst_2 : f32 to vector<1x384xf32>
    %9 = arith.mulf %7, %8 : vector<1x384xf32>
    %10 = vector.extract_strided_slice %0 {offsets = [3, 0], sizes = [1, 384], strides = [1, 1]} : vector<4x384xf32> to vector<1x384xf32>
    %cst_3 = arith.constant 5.000000e-01 : f32
    %11 = vector.broadcast %cst_3 : f32 to vector<1x384xf32>
    %12 = arith.mulf %10, %11 : vector<1x384xf32>
    %13 = arith.subf %3, %6 : vector<1x384xf32>
    %14 = arith.subf %13, %9 : vector<1x384xf32>
    %15 = arith.addf %14, %12 : vector<1x384xf32>
    %16 = arith.addf %3, %6 : vector<1x384xf32>
    %17 = arith.subf %16, %9 : vector<1x384xf32>
    %18 = arith.subf %17, %12 : vector<1x384xf32>
    %19 = arith.subf %3, %6 : vector<1x384xf32>
    %20 = arith.addf %19, %9 : vector<1x384xf32>
    %21 = arith.subf %20, %12 : vector<1x384xf32>
    %22 = arith.addf %3, %6 : vector<1x384xf32>
    %23 = arith.addf %22, %9 : vector<1x384xf32>
    %24 = arith.addf %23, %12 : vector<1x384xf32>
    %cst_4 = arith.constant 1.000000e+00 : f32
    %25 = vector.broadcast %cst_4 : f32 to vector<1x384xf32>
    %26 = arith.addf %15, %25 : vector<1x384xf32>
    %cst_5 = arith.constant 5.000000e-01 : f32
    %27 = vector.broadcast %cst_5 : f32 to vector<1x384xf32>
    %28 = arith.mulf %26, %27 : vector<1x384xf32>
    %cst_6 = arith.constant 0.000000e+00 : f32
    %cst_7 = arith.constant 1.000000e+00 : f32
    %29 = vector.broadcast %cst_6 : f32 to vector<1x384xf32>
    %30 = arith.maximumf %29, %28 : vector<1x384xf32>
    %31 = vector.broadcast %cst_7 : f32 to vector<1x384xf32>
    %32 = arith.minimumf %31, %30 : vector<1x384xf32>
    %cst_8 = arith.constant 1.000000e+00 : f32
    %33 = vector.broadcast %cst_8 : f32 to vector<1x384xf32>
    %34 = arith.addf %18, %33 : vector<1x384xf32>
    %cst_9 = arith.constant 5.000000e-01 : f32
    %35 = vector.broadcast %cst_9 : f32 to vector<1x384xf32>
    %36 = arith.mulf %34, %35 : vector<1x384xf32>
    %cst_10 = arith.constant 0.000000e+00 : f32
    %cst_11 = arith.constant 1.000000e+00 : f32
    %37 = vector.broadcast %cst_10 : f32 to vector<1x384xf32>
    %38 = arith.maximumf %37, %36 : vector<1x384xf32>
    %39 = vector.broadcast %cst_11 : f32 to vector<1x384xf32>
    %40 = arith.minimumf %39, %38 : vector<1x384xf32>
    %cst_12 = arith.constant 1.000000e+00 : f32
    %41 = vector.broadcast %cst_12 : f32 to vector<1x384xf32>
    %42 = arith.addf %21, %41 : vector<1x384xf32>
    %cst_13 = arith.constant 5.000000e-01 : f32
    %43 = vector.broadcast %cst_13 : f32 to vector<1x384xf32>
    %44 = arith.mulf %42, %43 : vector<1x384xf32>
    %cst_14 = arith.constant 0.000000e+00 : f32
    %cst_15 = arith.constant 1.000000e+00 : f32
    %45 = vector.broadcast %cst_14 : f32 to vector<1x384xf32>
    %46 = arith.maximumf %45, %44 : vector<1x384xf32>
    %47 = vector.broadcast %cst_15 : f32 to vector<1x384xf32>
    %48 = arith.minimumf %47, %46 : vector<1x384xf32>
    %cst_16 = arith.constant 1.000000e+00 : f32
    %49 = vector.broadcast %cst_16 : f32 to vector<1x384xf32>
    %50 = arith.addf %24, %49 : vector<1x384xf32>
    %cst_17 = arith.constant 5.000000e-01 : f32
    %51 = vector.broadcast %cst_17 : f32 to vector<1x384xf32>
    %52 = arith.mulf %50, %51 : vector<1x384xf32>
    %cst_18 = arith.constant 0.000000e+00 : f32
    %cst_19 = arith.constant 1.000000e+00 : f32
    %53 = vector.broadcast %cst_18 : f32 to vector<1x384xf32>
    %54 = arith.maximumf %53, %52 : vector<1x384xf32>
    %55 = vector.broadcast %cst_19 : f32 to vector<1x384xf32>
    %56 = arith.minimumf %55, %54 : vector<1x384xf32>
    %57 = tpu.concatenate %32, %40, %48, %56 in 0 : vector<1x384xf32>, vector<1x384xf32>, vector<1x384xf32>, vector<1x384xf32> -> vector<4x384xf32>
    %c0_20 = arith.constant 0 : index
    %c0_21 = arith.constant 0 : index
    %58 = vector.load %arg2[%c0_20, %c0_21] : memref<4x384xf32, #tpu.memory_space<vmem>>, vector<4x384xf32>
    tpu.vector_store %arg2[%c0_20, %c0_21], %57 {strides = array<i32>} : memref<4x384xf32, #tpu.memory_space<vmem>>, vector<4x384xf32>,
    return
  }
  func.func @transform_0(%arg0: i32) -> (i32, i32) {
    %c0_i32 = arith.constant 0 : i32
    %c0_i32_0 = arith.constant 0 : i32
    return %c0_i32, %arg0 : i32, i32
  }
  func.func @transform_1(%arg0: i32) -> (i32, i32) {
    %c0_i32 = arith.constant 0 : i32
    %c0_i32_0 = arith.constant 0 : i32
    return %c0_i32, %arg0 : i32, i32
  }
}

</mosaic_0001>

<bundles_post_ra>
// kernel: diffusion_net_forward.9
= control target key start
LH: loop header
LB: loop body
LE: loop exit
PB: predicated region body
PF: predicated region fallthrough
CT: control target
= control target key end

     0   :  { %vm90_vm0 = vcmask 1040384   ;;  %vm94_vm1 = vcmask 1041408   ;;  %vm98_vm2 = vcmask 1042432   ;;  %vm105_vm3 = vcmask 1043456   ;;  %s147_s0 = inlined_call_operand.vmem [shape: f32[4,384], index: 0, kind: input, shape index: {}]   ;;  %s148_s1 = inlined_call_operand.vmem [shape: f32[4,384], index: 1, kind: output, shape index: {}]  }
   0x1   :  { %v8_v0 = vld [vmem:[%s147_s0] sm:$0xff]  ;;  %v9_v1 = vld [vmem:[%s147_s0 + $0x8] sm:$0xf] }
   0x2   :  { %v114_v2 = vadd.f32 -0.5, %v8_v0  ;;  %v115_v3 = vadd.f32 -0.5, %v9_v1 }
   0x4   :  { %v14_v4 = vrot.slane %v114_v2, 6  ;;  %v22_v5 = vrot.slane %v114_v2, 5  ;;  %v30_v6 = vrot.slane %v114_v2, 7  ;;  %v38_v7 = vsub.f32 0.0, %v114_v2 }
   0x5   :  { %v16_v8 = vrot.slane %v115_v3, 6  ;;  %v24_v9 = vrot.slane %v115_v3, 5  ;;  %v32_v10 = vrot.slane %v115_v3, 7  ;;  %v39_v11 = vsub.f32 0.0, %v115_v3 }
   0x6   :  { %v15_v12 = vrot.slane %v14_v4, 4  ;;  %v23_v13 = vrot.slane %v22_v5, 4  ;;  %v31_v14 = vrot.slane %v30_v6, 4 }
   0x7   :  { %v17_v15 = vrot.slane %v16_v8, 4  ;;  %v25_v16 = vrot.slane %v24_v9, 4  ;;  %v33_v17 = vrot.slane %v32_v10, 4 }
   0x8   :  { %v20_v18 = vadd.f32 %v114_v2, %v15_v12  ;;  %v40_v19 = vsub.f32 %v38_v7, %v15_v12  ;;  %v46_v20 = vadd.f32 %v38_v7, %v15_v12  ;;  %v52_v21 = vsub.f32 %v114_v2, %v15_v12 }
   0x9   :  { %v21_v22 = vadd.f32 %v115_v3, %v17_v15  ;;  %v41_v23 = vsub.f32 %v39_v11, %v17_v15  ;;  %v47_v24 = vadd.f32 %v39_v11, %v17_v15  ;;  %v53_v25 = vsub.f32 %v115_v3, %v17_v15 }
   0xa   :  { %v28_v26 = vadd.f32 %v23_v13, %v20_v18  ;;  %v42_v27 = vadd.f32 %v40_v19, %v23_v13  ;;  %v48_v28 = vsub.f32 %v46_v20, %v23_v13  ;;  %v54_v29 = vsub.f32 %v52_v21, %v23_v13 }
   0xb   :  { %v29_v30 = vadd.f32 %v25_v16, %v21_v22  ;;  %v43_v31 = vadd.f32 %v41_v23, %v25_v16  ;;  %v49_v32 = vsub.f32 %v47_v24, %v25_v16  ;;  %v55_v33 = vsub.f32 %v53_v25, %v25_v16 }
   0xc   :  { %v36_v34 = vadd.f32 %v31_v14, %v28_v26  ;;  %v44_v35 = vadd.f32 %v42_v27, %v31_v14  ;;  %v50_v36 = vadd.f32 %v48_v28, %v31_v14  ;;  %v56_v37 = vadd.f32 %v54_v29, %v31_v14 }
   0xd   :  { %v37_v38 = vadd.f32 %v33_v17, %v29_v30  ;;  %v45_v39 = vadd.f32 %v43_v31, %v33_v17  ;;  %v51_v40 = vadd.f32 %v49_v32, %v33_v17  ;;  %v57_v41 = vadd.f32 %v55_v33, %v33_v17 }
   0xe   :  { %v60_v42 = vperm.slane %v36_v34, 0  ;;  %v61_v43 = vperm.slane %v36_v34, 4  ;;  %v68_v44 = vperm.slane %v44_v35, 0  ;;  %v69_v45 = vperm.slane %v44_v35, 4 }
   0xf   :  { %v76_v46 = vperm.slane %v50_v36, 0  ;;  %v77_v47 = vperm.slane %v50_v36, 4  ;;  %v84_v48 = vperm.slane %v56_v37, 0  ;;  %v85_v49 = vperm.slane %v56_v37, 4 }
  0x10   :  { %v91_v50 = vsel %vm90_vm0, %v60_v42, %v68_v44  ;;  %v92_v51 = vsel %vm90_vm0, %v61_v43, %v69_v45  ;;  %v62_v52 = vperm.slane %v37_v38, 0  ;;  %v70_v53 = vperm.slane %v45_v39, 0 }
  0x11   :  { %v95_v54 = vsel %vm94_vm1, %v91_v50, %v76_v46  ;;  %v96_v55 = vsel %vm94_vm1, %v92_v51, %v77_v47  ;;  %v78_v56 = vperm.slane %v51_v40, 0  ;;  %v86_v57 = vperm.slane %v57_v41, 0 }
  0x12   :  { %v99_v58 = vsel %vm98_vm2, %v95_v54, %v84_v48  ;;  %v100_v59 = vsel %vm98_vm2, %v96_v55, %v85_v49  ;;  %v93_v60 = vsel %vm90_vm0, %v62_v52, %v70_v53 }
  0x13   :  { %v104_v61 = vrot.slane %v100_v59, 4  ;;  %v97_v62 = vsel %vm94_vm1, %v93_v60, %v78_v56 }
  0x14   :  { %v101_v63 = vsel %vm98_vm2, %v97_v62, %v86_v57 }
  0x15   :  { %v106_v0 = vsel %vm105_vm3, %v99_v58, %v104_v61  ;;  %109 = vst [vmem:[%s148_s1 + $0x8] sm:$0xf] %v101_v63 }
  0x16   :  { %108 = vst [vmem:[%s148_s1] sm:$0xff] %v106_v0 }

// kernel: diffusion_net_forward.14
= control target key start
LH: loop header
LB: loop body
LE: loop exit
PB: predicated region body
PF: predicated region fallthrough
CT: control target
= control target key end

     0   :  { %s598_s18 = smov 0   ;;  %s600_s19 = smov 0   ;;  %s709_s0 = inlined_call_operand.vmem [shape: f32[6,3,64], index: 0, kind: input, shape index: {}]   ;;  %s710_s1 = inlined_call_operand.vmem [shape: f32[64,3], index: 1, kind: input, shape index: {}]   ;;  %s711_s2 = inlined_call_operand.vmem [shape: f32[64,1], index: 2, kind: input, shape index: {}]   ;;  %s712_s3 = inlined_call_operand.vmem [shape: f32[3,64], index: 3, kind: input, shape index: {}]   ;;  %s713_s4 = inlined_call_operand.vmem [shape: f32[3,1], index: 4, kind: input, shape index: {}]   ;;  %s714_s5 = inlined_call_operand.vmem [shape: f32[6,3,64], index: 5, kind: output, shape index: {}]  }
   0x1   :  { %s602_s20 = smov 0  }
   0x2 LB: > { %s27_s21 = sadd.s32 1, %s561_s19  ;;  %p498_p0 = scmp.ge.s32.totalorder %s565_s20, 1  ;;  %s565_s20 = sphi %s602_s20, %s15_s20   ;;  %s561_s19 = sphi %s600_s19, %s716_s19   ;;  %s557_s18 = sphi %s598_s18, %s715_s18  }
   0x3   : > { %p29_p1 = scmp.ge.s32.totalorder %s27_s21, 6  ;;  %p205_p2 = scmp.lt.s32.totalorder %s565_s20, 7 }
   0x5   : > { %s718_s21 = smov (%p29_p1, %s27_s21), 0  ;;  %p206_p3 = pnand %p498_p0, %p205_p2 }
   0x6   : > { %p237_p4 = scmp.lt.s32.totalorder (!%p206_p3), %s557_s18, 5 }
   0x7   : > { %209 = sbr.rel (%p206_p3) target bundleno = 311 (0x137), region = 40 }
   0xc   : > { %v267_v0 = vld [vmem:[%s711_s2 + $0x38] sm:$0xff]  ;;  %v265_v1 = vld [vmem:[%s711_s2 + $0x28] sm:$0xff]  ;;  %s720_s18 = smov (!%p237_p4, %s557_s18), 5  ;;  %v567_v2 = vmov 0   ;;  %vm333_vm0 = vcmask 1042432   ;;  %vm308_vm1 = vcmask 23552  }
   0xd   : > { %541 = vset.pattern.permute.xlu1 %v567_v2  ;;  %540 = vset.pattern.permute.xlu0 %v567_v2  ;;  %s499_s26 = sshll.u32 %s720_s18, 2  ;;  %v263_v3 = vld [vmem:[%s711_s2 + $0x18] sm:$0xff]  ;;  %v258_v5 = vld [vmem:[%s710_s1 + $0x30] sm:$0xff]  ;;  %v252_v7 = vld [vmem:[%s710_s1] sm:$0xff]  ;;  %vm393_vm2 = vcmask 523264   ;;  %vm418_vm3 = vcmask 518144  }
   0xe   : > { %305 = vperm.xlu0 %540, %v267_v0   ;;  %295 = vperm.xlu1 %541, %v265_v1   ;;  %s243_s6 = scalar_lea.vmem %s709_s0, %s499_s26  ;;  %v255_v4 = vld [vmem:[%s710_s1 + $0x18] sm:$0xff]  ;;  %v266_v8 = vld [vmem:[%s711_s2 + $0x30] sm:$0xff]  ;;  %v264_v9 = vld [vmem:[%s711_s2 + $0x20] sm:$0xff]  ;;  %s250_s23 = scalar_lea.vmem %s714_s5, %s499_s26 }
   0xf   : > { %542 = vset.pattern.permute.xlu2 %v567_v2  ;;  %v639_v6 = vld [vmem:[%s243_s6] sm:$0x7]  ;;  %v262_v10 = vld [vmem:[%s711_s2 + $0x10] sm:$0xff]  ;;  %v259_v12 = vld [vmem:[%s710_s1 + $0x38] sm:$0xff] }
  0x10   : > { %285 = vperm.xlu2 %542, %v263_v3   ;;  %513 = vmatpush.msk.msra.mxu2 %vm333_vm0, %v639_v6  ;;  %v256_v11 = vld [vmem:[%s710_s1 + $0x20] sm:$0xff]  ;;  %v253_v13 = vld [vmem:[%s710_s1 + $0x8] sm:$0xff]  ;;  %v254_v18 = vld [vmem:[%s710_s1 + $0x10] sm:$0xff] }
  0x11   : > { %514 = vmatpush.msk.msra.mxu3 %vm333_vm0, %v639_v6  ;;  %505 = vmatmul.msk.f32.vlgmr.msra.gmra.mxu2 %vm308_vm1, %v255_v4  ;;  %v261_v14 = vld [vmem:[%s711_s2 + $0x8] sm:$0xff]  ;;  %v260_v15 = vld [vmem:[%s711_s2] sm:$0xff] }
  0x12   : > { %508 = vmatmul.msk.f32.vlgmr.msra.gmra.mxu3 %vm308_vm1, %v258_v5  ;;  %501 = vmatpush.msk.msra.mxu0 %vm333_vm0, %v639_v6  ;;  %v387_v16 = vld [vmem:[%s713_s4] sm:$0x7]  ;;  %v257_v17 = vld [vmem:[%s710_s1 + $0x28] sm:$0xff] }
  0x13   : > { %502 = vmatmul.msk.f32.vlgmr.msra.gmra.mxu0 %vm308_vm1, %v252_v7  ;;  %v386_v51 = vld [vmem:[%s712_s3] sm:$0x7] }
  0x16   : > { %300 = vperm.xlu0 %540, %v266_v8   ;;  %290 = vperm.xlu1 %541, %v264_v9  }
  0x18   : > { %280 = vperm.xlu2 %542, %v262_v10  }
  0x19   : > { %506 = vmatmul.msk.f32.gmra.mxu2 %vm308_vm1, %v256_v11 }
  0x1a   : > { %509 = vmatmul.msk.f32.gmra.mxu3 %vm308_vm1, %v259_v12 }
  0x1b   : > { %503 = vmatmul.msk.f32.gmra.mxu0 %vm308_vm1, %v253_v13 }
  0x1e   : > { %275 = vperm.xlu0 %540, %v261_v14   ;;  %270 = vperm.xlu1 %541, %v260_v15  }
  0x20   : > { %390 = vperm.xlu2 %542, %v387_v16  }
  0x21   : > { %507 = vmatmul.msk.f32.gmra.mxu2 %vm308_vm1, %v257_v17 }
  0x23   : > { %504 = vmatmul.msk.f32.gmra.mxu0 %vm308_vm1, %v254_v18 }
  0x6a   : > { %v286_v30 = vpop.permute.xlu2 %285 }
  0x72   : > { %v281_v40 = vpop.permute.xlu2 %280 }
  0x7a   : > { %v391_v52 = vpop.permute.xlu2 %390 }
  0x80   : > { %v306_v19 = vpop.permute.xlu0 %305  ;;  %v296_v23 = vpop.permute.xlu1 %295 }
  0x88   : > { %v301_v24 = vpop.permute.xlu0 %300  ;;  %v291_v32 = vpop.permute.xlu1 %290 }
  0x90   : > { %v354_v20 = vpop.f32.mrf.mxu0  ;;  %v276_v41 = vpop.permute.xlu0 %275 }
  0x91   : > { %v271_v44 = vpop.permute.xlu1 %270 }
  0x92   : > { %v355_v47 = vadd.f32 %v354_v20, %v271_v44 }
  0x94   : > { %v363_v21 = vpop.f32.mrf.mxu2  ;;  %v378_v50 = vmax.f32 %v355_v47, 0.0 }
  0x95   : > { %v372_v22 = vpop.f32.mrf.mxu3  ;;  %v364_v38 = vadd.f32 %v363_v21, %v286_v30 }
  0x96   : > { %v373_v28 = vadd.f32 %v372_v22, %v301_v24 }
  0x97   : > { %v381_v45 = vmax.f32 %v364_v38, 0.0 }
  0x98   : > { %v357_v25 = vpop.f32.mrf.mxu0  ;;  %v384_v33 = vmax.f32 %v373_v28, 0.0 }
  0x99   : > { %v358_v46 = vadd.f32 %v357_v25, %v276_v41 }
  0x9b   : > { %v379_v49 = vmax.f32 %v358_v46, 0.0 }
  0x9c   : > { %v366_v26 = vpop.f32.mrf.mxu2 }
  0x9d   : > { %v375_v27 = vpop.f32.mrf.mxu3  ;;  %v367_v35 = vadd.f32 %v366_v26, %v291_v32 }
  0x9e   : > { %v376_v29 = vadd.f32 %v375_v27, %v306_v19 }
  0x9f   : > { %v382_v42 = vmax.f32 %v367_v35, 0.0 }
  0xa0   : > { %v385_v31 = vmax.f32 %v376_v29, 0.0  ;;  %v360_v37 = vpop.f32.mrf.mxu0 }
  0xa1   : > { %v361_v43 = vadd.f32 %v360_v37, %v281_v40 }
  0xa2   : > { %405 = vmatpush.msra.mxu1 %v385_v31 }
  0xa3   : > { %v380_v48 = vmax.f32 %v361_v43, 0.0 }
  0xa4   : > { %406 = vmatpush.msra.mxu1 %v384_v33  ;;  %v369_v34 = vpop.f32.mrf.mxu2 }
  0xa5   : > { %v370_v36 = vadd.f32 %v369_v34, %v296_v23 }
  0xa7   : > { %v383_v39 = vmax.f32 %v370_v36, 0.0 }
  0xa9   : > { %407 = vmatpush.msra.mxu1 %v383_v39 }
  0xab   : > { %408 = vmatpush.msra.mxu1 %v382_v42 }
  0xad   : > { %409 = vmatpush.msra.mxu1 %v381_v45 }
  0xaf   : > { %410 = vmatpush.msra.mxu1 %v380_v48 }
  0xb1   : > { %411 = vmatpush.msra.mxu1 %v379_v49 }
  0xb3   : > { %412 = vmatpush.msra.mxu1 %v378_v50 }
  0xb4   : > { %510 = vmatmul.msk.f32.vlgmr.msra.gmra.mxu1 %vm393_vm2, %v386_v51 }
 0x131   : > { %v414_v53 = vpop.f32.mrf.mxu1 }
 0x132   : > { %v415_v54 = vadd.f32 %v414_v53, %v391_v52 }
 0x134   : > { %v417_v55 = vadd.f32 %v415_v54, %v639_v6 }
 0x136   : > { %419 = vst.msk [vmem:[%s250_s23] sm:$0x7] %vm418_vm3, %v417_v55 }
 0x137 PF: > { %s15_s20 = sadd.s32 1, %s565_s20   ;;  %s715_s18 = smov %s561_s19 }
 0x138   : > { %p12_p5 = scmp.ge.s32.totalorder %s15_s20, 8   ;;  %s716_s19 = smov %s718_s21 }
 0x13a   :  { %14 = sbr.rel (!%p12_p5) target bundleno = 2 (0x2), region = 70 }

// kernel: diffusion_net_forward.10
= control target key start
LH: loop header
LB: loop body
LE: loop exit
PB: predicated region body
PF: predicated region fallthrough
CT: control target
= control target key end

     0   :  { %vm39_vm0 = vcmask 1040384   ;;  %vm41_vm1 = vcmask 1041408   ;;  %vm43_vm2 = vcmask 1042432   ;;  %vm45_vm3 = vcmask 781312   ;;  %s67_s0 = inlined_call_operand.vmem [shape: f32[4,96], index: 0, kind: input, shape index: {}]   ;;  %s68_s1 = inlined_call_operand.vmem [shape: f32[4,96], index: 1, kind: output, shape index: {}]  }
   0x1   :  { %v8_v0 = vld [vmem:[%s67_s0] sm:$0xf] }
   0x2   :  { %v9_v1 = vmul.f32 0.5, %v8_v0 }
   0x4   :  { %v11_v2 = vrot.slane %v9_v1, 2  ;;  %v14_v3 = vrot.slane %v9_v1, 1  ;;  %v20_v4 = vsub.f32 0.0, %v9_v1  ;;  %v17_v5 = vrot.slane %v9_v1, 3 }
   0x6   :  { %v13_v6 = vadd.f32 %v11_v2, %v9_v1  ;;  %v21_v7 = vsub.f32 %v20_v4, %v11_v2  ;;  %v24_v8 = vadd.f32 %v20_v4, %v11_v2  ;;  %v27_v9 = vsub.f32 %v9_v1, %v11_v2 }
   0x8   :  { %v16_v10 = vadd.f32 %v14_v3, %v13_v6  ;;  %v22_v11 = vadd.f32 %v21_v7, %v14_v3  ;;  %v25_v12 = vsub.f32 %v24_v8, %v14_v3  ;;  %v28_v13 = vsub.f32 %v27_v9, %v14_v3 }
   0xa   :  { %v19_v14 = vadd.f32 %v17_v5, %v16_v10  ;;  %v23_v15 = vadd.f32 %v22_v11, %v17_v5  ;;  %v26_v16 = vadd.f32 %v25_v12, %v17_v5  ;;  %v29_v17 = vadd.f32 %v28_v13, %v17_v5 }
   0xc   :  { %v31_v18 = vrot.slane %v23_v15, 7  ;;  %v34_v19 = vrot.slane %v26_v16, 6  ;;  %v37_v20 = vrot.slane %v29_v17, 5 }
   0xe   :  { %v40_v21 = vsel %vm39_vm0, %v19_v14, %v31_v18 }
   0xf   :  { %v42_v22 = vsel %vm41_vm1, %v40_v21, %v34_v19 }
  0x10   :  { %v44_v23 = vsel %vm43_vm2, %v42_v22, %v37_v20 }
  0x11   :  { %46 = vst.msk [vmem:[%s68_s1] sm:$0xf] %vm45_vm3, %v44_v23 }

// kernel: diffusion_net_forward.12
= control target key start
LH: loop header
LB: loop body
LE: loop exit
PB: predicated region body
PF: predicated region fallthrough
CT: control target
= control target key end

     0   :  { %s598_s18 = smov 0   ;;  %s600_s19 = smov 0   ;;  %s709_s0 = inlined_call_operand.vmem [shape: f32[6,3,16], index: 0, kind: input, shape index: {}]   ;;  %s710_s1 = inlined_call_operand.vmem [shape: f32[64,3], index: 1, kind: input, shape index: {}]   ;;  %s711_s2 = inlined_call_operand.vmem [shape: f32[64,1], index: 2, kind: input, shape index: {}]   ;;  %s712_s3 = inlined_call_operand.vmem [shape: f32[3,64], index: 3, kind: input, shape index: {}]   ;;  %s713_s4 = inlined_call_operand.vmem [shape: f32[3,1], index: 4, kind: input, shape index: {}]   ;;  %s714_s5 = inlined_call_operand.vmem [shape: f32[6,3,16], index: 5, kind: output, shape index: {}]  }
   0x1   :  { %s602_s20 = smov 0  }
   0x2 LB: > { %s27_s21 = sadd.s32 1, %s561_s19  ;;  %p498_p0 = scmp.ge.s32.totalorder %s565_s20, 1  ;;  %s565_s20 = sphi %s602_s20, %s15_s20   ;;  %s561_s19 = sphi %s600_s19, %s716_s19   ;;  %s557_s18 = sphi %s598_s18, %s715_s18  }
   0x3   : > { %p29_p1 = scmp.ge.s32.totalorder %s27_s21, 6  ;;  %p205_p2 = scmp.lt.s32.totalorder %s565_s20, 7 }
   0x5   : > { %s718_s21 = smov (%p29_p1, %s27_s21), 0  ;;  %p206_p3 = pnand %p498_p0, %p205_p2 }
   0x6   : > { %p237_p4 = scmp.lt.s32.totalorder (!%p206_p3), %s557_s18, 5 }
   0x7   : > { %209 = sbr.rel (%p206_p3) target bundleno = 311 (0x137), region = 40 }
   0xc   : > { %v267_v0 = vld [vmem:[%s711_s2 + $0x38] sm:$0xff]  ;;  %v265_v1 = vld [vmem:[%s711_s2 + $0x28] sm:$0xff]  ;;  %s720_s18 = smov (!%p237_p4, %s557_s18), 5  ;;  %v567_v2 = vmov 0   ;;  %vm333_vm0 = vcmask 1042432   ;;  %vm308_vm1 = vcmask 23552  }
   0xd   : > { %541 = vset.pattern.permute.xlu1 %v567_v2  ;;  %540 = vset.pattern.permute.xlu0 %v567_v2  ;;  %s499_s26 = sshll.u32 %s720_s18, 2  ;;  %v263_v3 = vld [vmem:[%s711_s2 + $0x18] sm:$0xff]  ;;  %v258_v5 = vld [vmem:[%s710_s1 + $0x30] sm:$0xff]  ;;  %v252_v7 = vld [vmem:[%s710_s1] sm:$0xff]  ;;  %vm393_vm2 = vcmask 523264   ;;  %vm418_vm3 = vcmask 124928  }
   0xe   : > { %305 = vperm.xlu0 %540, %v267_v0   ;;  %295 = vperm.xlu1 %541, %v265_v1   ;;  %s243_s6 = scalar_lea.vmem %s709_s0, %s499_s26  ;;  %v255_v4 = vld [vmem:[%s710_s1 + $0x18] sm:$0xff]  ;;  %v266_v8 = vld [vmem:[%s711_s2 + $0x30] sm:$0xff]  ;;  %v264_v9 = vld [vmem:[%s711_s2 + $0x20] sm:$0xff]  ;;  %s250_s23 = scalar_lea.vmem %s714_s5, %s499_s26 }
   0xf   : > { %542 = vset.pattern.permute.xlu2 %v567_v2  ;;  %v639_v6 = vld [vmem:[%s243_s6] sm:$0x7]  ;;  %v262_v10 = vld [vmem:[%s711_s2 + $0x10] sm:$0xff]  ;;  %v259_v12 = vld [vmem:[%s710_s1 + $0x38] sm:$0xff] }
  0x10   : > { %285 = vperm.xlu2 %542, %v263_v3   ;;  %513 = vmatpush.msk.msra.mxu2 %vm333_vm0, %v639_v6  ;;  %v256_v11 = vld [vmem:[%s710_s1 + $0x20] sm:$0xff]  ;;  %v253_v13 = vld [vmem:[%s710_s1 + $0x8] sm:$0xff]  ;;  %v254_v18 = vld [vmem:[%s710_s1 + $0x10] sm:$0xff] }
  0x11   : > { %514 = vmatpush.msk.msra.mxu3 %vm333_vm0, %v639_v6  ;;  %505 = vmatmul.msk.f32.vlgmr.msra.gmra.mxu2 %vm308_vm1, %v255_v4  ;;  %v261_v14 = vld [vmem:[%s711_s2 + $0x8] sm:$0xff]  ;;  %v260_v15 = vld [vmem:[%s711_s2] sm:$0xff] }
  0x12   : > { %508 = vmatmul.msk.f32.vlgmr.msra.gmra.mxu3 %vm308_vm1, %v258_v5  ;;  %501 = vmatpush.msk.msra.mxu0 %vm333_vm0, %v639_v6  ;;  %v387_v16 = vld [vmem:[%s713_s4] sm:$0x7]  ;;  %v257_v17 = vld [vmem:[%s710_s1 + $0x28] sm:$0xff] }
  0x13   : > { %502 = vmatmul.msk.f32.vlgmr.msra.gmra.mxu0 %vm308_vm1, %v252_v7  ;;  %v386_v51 = vld [vmem:[%s712_s3] sm:$0x7] }
  0x16   : > { %300 = vperm.xlu0 %540, %v266_v8   ;;  %290 = vperm.xlu1 %541, %v264_v9  }
  0x18   : > { %280 = vperm.xlu2 %542, %v262_v10  }
  0x19   : > { %506 = vmatmul.msk.f32.gmra.mxu2 %vm308_vm1, %v256_v11 }
  0x1a   : > { %509 = vmatmul.msk.f32.gmra.mxu3 %vm308_vm1, %v259_v12 }
  0x1b   : > { %503 = vmatmul.msk.f32.gmra.mxu0 %vm308_vm1, %v253_v13 }
  0x1e   : > { %275 = vperm.xlu0 %540, %v261_v14   ;;  %270 = vperm.xlu1 %541, %v260_v15  }
  0x20   : > { %390 = vperm.xlu2 %542, %v387_v16  }
  0x21   : > { %507 = vmatmul.msk.f32.gmra.mxu2 %vm308_vm1, %v257_v17 }
  0x23   : > { %504 = vmatmul.msk.f32.gmra.mxu0 %vm308_vm1, %v254_v18 }
  0x6a   : > { %v286_v30 = vpop.permute.xlu2 %285 }
  0x72   : > { %v281_v40 = vpop.permute.xlu2 %280 }
  0x7a   : > { %v391_v52 = vpop.permute.xlu2 %390 }
  0x80   : > { %v306_v19 = vpop.permute.xlu0 %305  ;;  %v296_v23 = vpop.permute.xlu1 %295 }
  0x88   : > { %v301_v24 = vpop.permute.xlu0 %300  ;;  %v291_v32 = vpop.permute.xlu1 %290 }
  0x90   : > { %v354_v20 = vpop.f32.mrf.mxu0  ;;  %v276_v41 = vpop.permute.xlu0 %275 }
  0x91   : > { %v271_v44 = vpop.permute.xlu1 %270 }
  0x92   : > { %v355_v47 = vadd.f32 %v354_v20, %v271_v44 }
  0x94   : > { %v363_v21 = vpop.f32.mrf.mxu2  ;;  %v378_v50 = vmax.f32 %v355_v47, 0.0 }
  0x95   : > { %v372_v22 = vpop.f32.mrf.mxu3  ;;  %v364_v38 = vadd.f32 %v363_v21, %v286_v30 }
  0x96   : > { %v373_v28 = vadd.f32 %v372_v22, %v301_v24 }
  0x97   : > { %v381_v45 = vmax.f32 %v364_v38, 0.0 }
  0x98   : > { %v357_v25 = vpop.f32.mrf.mxu0  ;;  %v384_v33 = vmax.f32 %v373_v28, 0.0 }
  0x99   : > { %v358_v46 = vadd.f32 %v357_v25, %v276_v41 }
  0x9b   : > { %v379_v49 = vmax.f32 %v358_v46, 0.0 }
  0x9c   : > { %v366_v26 = vpop.f32.mrf.mxu2 }
  0x9d   : > { %v375_v27 = vpop.f32.mrf.mxu3  ;;  %v367_v35 = vadd.f32 %v366_v26, %v291_v32 }
  0x9e   : > { %v376_v29 = vadd.f32 %v375_v27, %v306_v19 }
  0x9f   : > { %v382_v42 = vmax.f32 %v367_v35, 0.0 }
  0xa0   : > { %v385_v31 = vmax.f32 %v376_v29, 0.0  ;;  %v360_v37 = vpop.f32.mrf.mxu0 }
  0xa1   : > { %v361_v43 = vadd.f32 %v360_v37, %v281_v40 }
  0xa2   : > { %405 = vmatpush.msra.mxu1 %v385_v31 }
  0xa3   : > { %v380_v48 = vmax.f32 %v361_v43, 0.0 }
  0xa4   : > { %406 = vmatpush.msra.mxu1 %v384_v33  ;;  %v369_v34 = vpop.f32.mrf.mxu2 }
  0xa5   : > { %v370_v36 = vadd.f32 %v369_v34, %v296_v23 }
  0xa7   : > { %v383_v39 = vmax.f32 %v370_v36, 0.0 }
  0xa9   : > { %407 = vmatpush.msra.mxu1 %v383_v39 }
  0xab   : > { %408 = vmatpush.msra.mxu1 %v382_v42 }
  0xad   : > { %409 = vmatpush.msra.mxu1 %v381_v45 }
  0xaf   : > { %410 = vmatpush.msra.mxu1 %v380_v48 }
  0xb1   : > { %411 = vmatpush.msra.mxu1 %v379_v49 }
  0xb3   : > { %412 = vmatpush.msra.mxu1 %v378_v50 }
  0xb4   : > { %510 = vmatmul.msk.f32.vlgmr.msra.gmra.mxu1 %vm393_vm2, %v386_v51 }
 0x131   : > { %v414_v53 = vpop.f32.mrf.mxu1 }
 0x132   : > { %v415_v54 = vadd.f32 %v414_v53, %v391_v52 }
 0x134   : > { %v417_v55 = vadd.f32 %v415_v54, %v639_v6 }
 0x136   : > { %419 = vst.msk [vmem:[%s250_s23] sm:$0x7] %vm418_vm3, %v417_v55 }
 0x137 PF: > { %s15_s20 = sadd.s32 1, %s565_s20   ;;  %s715_s18 = smov %s561_s19 }
 0x138   : > { %p12_p5 = scmp.ge.s32.totalorder %s15_s20, 8   ;;  %s716_s19 = smov %s718_s21 }
 0x13a   :  { %14 = sbr.rel (!%p12_p5) target bundleno = 2 (0x2), region = 70 }

// kernel: diffusion_net_forward.13
= control target key start
LH: loop header
LB: loop body
LE: loop exit
PB: predicated region body
PF: predicated region fallthrough
CT: control target
= control target key end

     0   :  { %vm36_vm0 = vcmask 1040384   ;;  %vm38_vm1 = vcmask 1041408   ;;  %vm40_vm2 = vcmask 1042432   ;;  %vm42_vm3 = vcmask 781312   ;;  %s64_s0 = inlined_call_operand.vmem [shape: f32[4,96], index: 0, kind: input, shape index: {}]   ;;  %s65_s1 = inlined_call_operand.vmem [shape: f32[4,96], index: 1, kind: output, shape index: {}]  }
   0x1   :  { %v8_v0 = vld [vmem:[%s64_s0] sm:$0xf] }
   0x2   :  { %v9_v1 = vmul.f32 0.5, %v8_v0 }
   0x4   :  { %v11_v2 = vrot.slane %v9_v1, 1  ;;  %v14_v3 = vrot.slane %v9_v1, 2  ;;  %v17_v5 = vrot.slane %v9_v1, 3 }
   0x6   :  { %v13_v4 = vsub.f32 %v9_v1, %v11_v2  ;;  %v20_v6 = vadd.f32 %v11_v2, %v9_v1 }
   0x8   :  { %v16_v7 = vsub.f32 %v13_v4, %v14_v3  ;;  %v21_v8 = vsub.f32 %v20_v6, %v14_v3  ;;  %v23_v9 = vadd.f32 %v14_v3, %v13_v4  ;;  %v25_v10 = vadd.f32 %v20_v6, %v14_v3 }
   0xa   :  { %v19_v11 = vadd.f32 %v17_v5, %v16_v7  ;;  %v22_v12 = vsub.f32 %v21_v8, %v17_v5  ;;  %v24_v13 = vsub.f32 %v23_v9, %v17_v5  ;;  %v26_v14 = vadd.f32 %v25_v10, %v17_v5 }
   0xc   :  { %v28_v15 = vrot.slane %v22_v12, 7  ;;  %v31_v16 = vrot.slane %v24_v13, 6  ;;  %v34_v17 = vrot.slane %v26_v14, 5 }
   0xe   :  { %v37_v18 = vsel %vm36_vm0, %v19_v11, %v28_v15 }
   0xf   :  { %v39_v19 = vsel %vm38_vm1, %v37_v18, %v31_v16 }
  0x10   :  { %v41_v20 = vsel %vm40_vm2, %v39_v19, %v34_v17 }
  0x11   :  { %43 = vst.msk [vmem:[%s65_s1] sm:$0xf] %vm42_vm3, %v41_v20 }

// kernel: diffusion_net_forward.11
= control target key start
LH: loop header
LB: loop body
LE: loop exit
PB: predicated region body
PF: predicated region fallthrough
CT: control target
= control target key end

     0   :  { %s1261_s13 = smov 0   ;;  %s1263_s14 = smov 0   ;;  %s1576_s0 = inlined_call_operand.vmem [shape: f32[2,3,16], index: 0, kind: input, shape index: {}]   ;;  %s1577_s1 = inlined_call_operand.vmem [shape: f32[2,3,16], index: 1, kind: input, shape index: {}, may-alias: {1,10}]   ;;  %s1578_s2 = inlined_call_operand.vmem [shape: f32[4,1,32], index: 2, kind: input, shape index: {}]   ;;  %s1579_s3 = inlined_call_operand.vmem [shape: f32[32,32], index: 3, kind: input, shape index: {}]   ;;  %s1580_s4 = inlined_call_operand.vmem [shape: f32[32,1], index: 4, kind: input, shape index: {}]   ;;  %s1581_s5 = inlined_call_operand.vmem [shape: f32[32,3], index: 5, kind: input, shape index: {}]   ;;  %s1582_s6 = inlined_call_operand.vmem [shape: f32[32,3], index: 6, kind: input, shape index: {}]   ;;  %s1583_s7 = inlined_call_operand.vmem [shape: f32[32,1], index: 7, kind: input, shape index: {}]   ;;  %s1584_s8 = inlined_call_operand.vmem [shape: f32[3,32], index: 8, kind: input, shape index: {}]   ;;  %s1585_s9 = inlined_call_operand.vmem [shape: f32[3,1], index: 9, kind: input, shape index: {}]   ;;  %s1586_s10 = inlined_call_operand.vmem [shape: f32[2,3,16], index: 10, kind: output, shape index: {}, may-alias: {1,10}]  }
   0x1   :  { %s1265_s15 = smov 0  }
   0x2 LB: > { %s32_s16 = sadd.s32 1, %s1199_s14  ;;  %p1110_p0 = scmp.ge.s32.totalorder %s1203_s15, 1  ;;  %s1203_s15 = sphi %s1265_s15, %s20_s15   ;;  %s1199_s14 = sphi %s1263_s14, %s1588_s14   ;;  %s1195_s13 = sphi %s1261_s13, %s1587_s13  }
   0x3   : > { %p34_p1 = scmp.ge.s32.totalorder %s32_s16, 2  ;;  %p344_p2 = scmp.lt.s32.totalorder %s1203_s15, 3 }
   0x5   : > { %s1590_s16 = smov (%p34_p1, %s32_s16), 0  ;;  %p345_p3 = pnand %p1110_p0, %p344_p2 }
   0x6   : > { %p393_p4 = scmp.lt.s32.totalorder (!%p345_p3), %s1195_s13, 1 }
   0x7   : > { %348 = sbr.rel (%p345_p3) target bundleno = 1351 (0x547), region = 60 }
   0xc   : > { %v1282_v0 = vld [vmem:[%s1579_s3 + $0x18] sm:$0xff]  ;;  %v1177_v1 = vld [vmem:[%s1578_s2] ss:$0 sm:$0xff]  ;;  %vm478_vm0 = vcmask 261120   ;;  %v1290_v2 = vld [vmem:[%s1579_s3 + $0x8] sm:$0xff]  ;;  %v1205_v5 = vmov 0  }
   0xd   : > { %v477_v3 = vmul.f32 %v1177_v1, %v1282_v0  ;;  %v475_v4 = vmul.f32 %v1177_v1, %v1290_v2  ;;  %1174 = vset.pattern.permute.xlu0 %v1205_v5  ;;  %1176 = vset.pattern.permute.xlu1 %v1205_v5  ;;  %v1297_v6 = vld [vmem:[%s1579_s3 + $0x10] sm:$0xff]  ;;  %v1302_v7 = vld [vmem:[%s1579_s3] sm:$0xff]  ;;  %s1592_s13 = smov (!%p393_p4, %s1195_s13), 1  ;;  %vm433_vm1 = vcmask 1042432   ;;  %vm420_vm2 = vcmask 23552   ;;  %v1324_v14 = vld [vmem:[%s1582_s6 + $0x8] sm:$0xff] }
   0xe   : > { %1175 = vset.pattern.permute.xlu2 %v1205_v5  ;;  %s1306_s27 = sshll.u32 %s1592_s13, 2  ;;  %v476_v10 = vmul.f32 %v1177_v1, %v1297_v6  ;;  %v474_v11 = vmul.f32 %v1177_v1, %v1302_v7  ;;  %v416_v12 = vld [vmem:[%s1581_s5] sm:$0xff]  ;;  %v417_v18 = vld [vmem:[%s1581_s5 + $0x8] sm:$0xff]  ;;  %v582_v19 = vld [vmem:[%s1583_s7 + $0x18] sm:$0xff]  ;;  %vm1015_vm3 = vcmask 124928  }
   0xf   : > { %v488_v8 = vsel %vm478_vm0, %v477_v3, 0.0  ;;  %v482_v9 = vsel %vm478_vm0, %v475_v4, 0.0  ;;  %s399_s30 = scalar_lea.vmem %s1576_s0, %s1306_s27  ;;  %s406_s18 = scalar_lea.vmem %s1577_s1, %s1306_s27  ;;  %v418_v20 = vld [vmem:[%s1581_s5 + $0x10] sm:$0xff]  ;;  %v419_v22 = vld [vmem:[%s1581_s5 + $0x18] sm:$0xff]  ;;  %v1370_v24 = vld [vmem:[%s1582_s6] sm:$0xff] }
  0x10   : > { %489 = vadd.xlane.f32.xlu0 %v488_v8  ;;  %483 = vadd.xlane.f32.xlu1 %v482_v9  ;;  %v414_v13 = vld [vmem:[%s399_s30] sm:$0x7]  ;;  %v485_v16 = vsel %vm478_vm0, %v476_v10, 0.0  ;;  %v479_v17 = vsel %vm478_vm0, %v474_v11, 0.0  ;;  %v1351_v21 = vld [vmem:[%s1582_s6 + $0x10] sm:$0xff]  ;;  %v1362_v23 = vld [vmem:[%s1582_s6 + $0x18] sm:$0xff]  ;;  %s413_s30 = scalar_lea.vmem %s1586_s10, %s1306_s27 }
  0x11   : > { %1114 = vmatpush.msk.msra.mxu0 %vm433_vm1, %v414_v13  ;;  %v1327_v15 = vld [vmem:[%s406_s18] sm:$0x7]  ;;  %v1382_v28 = vld [vmem:[%s1580_s4 + $0x18] sm:$0xff]  ;;  %v1387_v29 = vld [vmem:[%s1580_s4 + $0x8] sm:$0xff] }
  0x12   : > { %1115 = vmatmul.msk.f32.vlgmr.msra.gmra.mxu0 %vm420_vm2, %v416_v12  ;;  %1148 = vmatpush.msk.msra.mxu1 %vm433_vm1, %v1327_v15  ;;  %v1178_v25 = vld [vmem:[%s1578_s2 + $0x1] ss:$0 sm:$0xff]  ;;  %v1394_v36 = vld [vmem:[%s1580_s4 + $0x10] sm:$0xff]  ;;  %v580_v42 = vld [vmem:[%s1583_s7 + $0x8] sm:$0xff] }
  0x13   : > { %1121 = vmatmul.msk.f32.vlgmr.msra.gmra.mxu1 %vm420_vm2, %v1324_v14  ;;  %1119 = vmatpush.msk.msrb.mxu0 %vm433_vm1, %v1327_v15  ;;  %v653_v26 = vmul.f32 %v1178_v25, %v1290_v2  ;;  %v612_v39 = vld [vmem:[%s1585_s9] sm:$0x7]  ;;  %v581_v41 = vld [vmem:[%s1583_s7 + $0x10] sm:$0xff]  ;;  %v654_v48 = vmul.f32 %v1178_v25, %v1297_v6  ;;  %v655_v58 = vmul.f32 %v1178_v25, %v1282_v0 }
  0x14   : > { %v1409_v43 = vld [vmem:[%s1580_s4] sm:$0xff]  ;;  %v652_v61 = vmul.f32 %v1178_v25, %v1302_v7 }
  0x15   : > { %v659_v27 = vsel %vm478_vm0, %v653_v26, 0.0  ;;  %v579_v47 = vld [vmem:[%s1583_s7] sm:$0xff]  ;;  %v662_v49 = vsel %vm478_vm0, %v654_v48, 0.0  ;;  %v665_v60 = vsel %vm478_vm0, %v655_v58, 0.0 }
  0x16   : > { %v656_v1 = vsel %vm478_vm0, %v652_v61, 0.0  ;;  %v1179_v12 = vld [vmem:[%s1578_s2 + $0x2] ss:$0 sm:$0xff] }
  0x17   : > { %v775_v25 = vmul.f32 %v1179_v12, %v1302_v7 }
  0x18   : > { %486 = vadd.xlane.f32.xlu0 %v485_v16  ;;  %480 = vadd.xlane.f32.xlu1 %v479_v17  ;;  %v778_v16 = vmul.f32 %v1179_v12, %v1282_v0 }
  0x1a   : > { %1116 = vmatmul.msk.f32.gmra.mxu0 %vm420_vm2, %v417_v18 }
  0x1b   : > { %1122 = vmatmul.msk.f32.gmra.mxu1 %vm420_vm2, %v1351_v21 }
  0x22   : > { %1117 = vmatmul.msk.f32.gmra.mxu0 %vm420_vm2, %v418_v20  ;;  %v788_v20 = vsel %vm478_vm0, %v778_v16, 0.0 }
  0x23   : > { %1123 = vmatmul.msk.f32.gmra.mxu1 %vm420_vm2, %v1362_v23 }
  0x2a   : > { %1118 = vmatmul.msk.f32.gmra.mxu0 %vm420_vm2, %v419_v22 }
  0x2c   : > { %600 = vperm.xlu0 %1174, %v582_v19  }
  0x32   : > { %1120 = vmatmul.msk.f32.vlgmr.msrb.gmra.mxu0 %vm420_vm2, %v1370_v24 }
  0x56   : > { %660 = vadd.xlane.f32.xlu0 %v659_v27 }
  0x83   : > { %v490_v30 = vpop.xlane.xlu0 %489  ;;  %v484_v31 = vpop.xlane.xlu1 %483 }
  0x84   : > { %v498_v32 = vadd.f32 %v1382_v28, %v490_v30  ;;  %v496_v33 = vadd.f32 %v1387_v29, %v484_v31 }
  0x86   : > { %v502_v34 = vmax.f32 %v498_v32, 0.0  ;;  %v500_v35 = vmax.f32 %v496_v33, 0.0  ;;  %v779_v32 = vsel %vm478_vm0, %v775_v25, 0.0 }
  0x88   : > { %572 = vperm.xlu2 %1175, %v502_v34   ;;  %562 = vperm.xlu1 %1176, %v500_v35  }
  0x8b   : > { %v487_v37 = vpop.xlane.xlu0 %486  ;;  %v481_v44 = vpop.xlane.xlu1 %480 }
  0x8c   : > { %v497_v38 = vadd.f32 %v1394_v36, %v487_v37  ;;  %v495_v45 = vadd.f32 %v1409_v43, %v481_v44 }
  0x8e   : > { %v501_v40 = vmax.f32 %v497_v38, 0.0  ;;  %v499_v46 = vmax.f32 %v495_v45, 0.0 }
  0x8f   : > { %v1419_v51 = vpop.f32.mrf.mxu0 }
  0x90   : > { %567 = vperm.xlu2 %1175, %v501_v40   ;;  %615 = vperm.xlu1 %1176, %v612_v39   ;;  %v542_v52 = vpop.f32.mrf.mxu1 }
  0x97   : > { %v1422_v55 = vpop.f32.mrf.mxu0 }
  0x98   : > { %595 = vperm.xlu2 %1175, %v581_v41   ;;  %v545_v57 = vpop.f32.mrf.mxu1  ;;  %v552_v22 = vadd.f32 %v542_v52, %v1422_v55 }
  0x9e   : > { %v1417_v50 = vpop.permute.xlu0 %600 }
  0x9f   : > { %v1425_v59 = vpop.f32.mrf.mxu0 }
  0xa0   : > { %590 = vperm.xlu2 %1175, %v580_v42   ;;  %v548_v62 = vpop.f32.mrf.mxu1  ;;  %v553_v11 = vadd.f32 %v545_v57, %v1425_v59  ;;  %v1456_v42 = vld [vmem:[%s1584_s8] sm:$0x7] }
  0xa7   : > { %v1429_v63 = vpop.f32.mrf.mxu0 }
  0xa8   : > { %557 = vperm.xlu2 %1175, %v499_v46   ;;  %v554_v3 = vadd.f32 %v548_v62, %v1429_v63 }
  0xaf   : > { %v539_v35 = vpop.f32.mrf.mxu0 }
  0xb0   : > { %585 = vperm.xlu2 %1175, %v579_v47   ;;  %v551_v37 = vadd.f32 %v539_v35, %v1419_v51 }
  0xba   : > { %663 = vadd.xlane.f32.xlu1 %v662_v49 }
  0xc9   : > { %v661_v53 = vpop.xlane.xlu0 %660 }
  0xca   : > { %v669_v54 = vadd.f32 %v661_v53, %v1387_v29 }
  0xcc   : > { %v673_v56 = vmax.f32 %v669_v54, 0.0  ;;  %v777_v54 = vmul.f32 %v1179_v12, %v1297_v6 }
  0xce   : > { %719 = vperm.xlu0 %1174, %v673_v56   ;;  %v785_v58 = vsel %vm478_vm0, %v777_v54, 0.0 }
  0xd9   : > { %666 = vadd.xlane.f32.xlu2 %v665_v60 }
  0xe1   : > { %657 = vadd.xlane.f32.xlu2 %v656_v1 }
  0xe2   : > { %v573_v4 = vpop.permute.xlu2 %572 }
  0xe3   : > { %v578_v5 = vadd.f32 %v573_v4, %v554_v3 }
  0xe5   : > { %v606_v8 = vadd.f32 %v1417_v50, %v578_v5 }
  0xe7   : > { %v610_v9 = vmax.f32 %v606_v8, 0.0  ;;  %v776_v8 = vmul.f32 %v1179_v12, %v1290_v2  ;;  %v1180_v12 = vld [vmem:[%s1578_s2 + $0x3] ss:$0 sm:$0xff] }
  0xe8   : > { %v899_v25 = vmul.f32 %v1180_v12, %v1290_v2  ;;  %v900_v35 = vmul.f32 %v1180_v12, %v1297_v6 }
  0xe9   : > { %633 = vmatpush.msra.mxu2 %v610_v9  ;;  %v782_v9 = vsel %vm478_vm0, %v776_v8, 0.0 }
  0xea   : > { %v568_v10 = vpop.permute.xlu2 %567 }
  0xeb   : > { %v577_v13 = vadd.f32 %v568_v10, %v553_v11 }
  0xf2   : > { %v1439_v17 = vpop.permute.xlu2 %595 }
  0xf3   : > { %v605_v18 = vadd.f32 %v1439_v17, %v577_v13 }
  0xf5   : > { %v609_v19 = vmax.f32 %v605_v18, 0.0 }
  0xf7   : > { %634 = vmatpush.msra.mxu2 %v609_v19 }
  0xf8   : > { %789 = vadd.xlane.f32.xlu0 %v788_v20 }
  0xfa   : > { %v1445_v26 = vpop.permute.xlu2 %590  ;;  %v563_v27 = vpop.permute.xlu1 %562 }
  0xfb   : > { %v576_v30 = vadd.f32 %v563_v27, %v552_v22  ;;  %v905_v27 = vsel %vm478_vm0, %v899_v25, 0.0 }
  0xfd   : > { %v604_v31 = vadd.f32 %v1445_v26, %v576_v30 }
  0xff   : > { %v608_v33 = vmax.f32 %v604_v31, 0.0 }
 0x100   : > { %780 = vadd.xlane.f32.xlu0 %v779_v32 }
 0x101   : > { %635 = vmatpush.msra.mxu2 %v608_v33 }
 0x102   : > { %v558_v34 = vpop.permute.xlu2 %557  ;;  %v1460_v44 = vpop.permute.xlu1 %615 }
 0x103   : > { %v575_v38 = vadd.f32 %v558_v34, %v551_v37 }
 0x10a   : > { %v1450_v39 = vpop.permute.xlu2 %585 }
 0x10b   : > { %v603_v40 = vadd.f32 %v1450_v39, %v575_v38 }
 0x10d   : > { %v607_v41 = vmax.f32 %v603_v40, 0.0  ;;  %v908_v40 = vsel %vm478_vm0, %v900_v35, 0.0 }
 0x10f   : > { %636 = vmatpush.msra.mxu2 %v607_v41  ;;  %v901_v41 = vmul.f32 %v1180_v12, %v1282_v0 }
 0x110   : > { %1124 = vmatmul.msk.f32.vlgmr.msra.gmra.mxu2 %vm478_vm0, %v1456_v42 }
 0x12d   : > { %v664_v45 = vpop.xlane.xlu1 %663 }
 0x12e   : > { %v670_v46 = vadd.f32 %v664_v45, %v1394_v36  ;;  %v911_v45 = vsel %vm478_vm0, %v901_v41, 0.0 }
 0x130   : > { %v674_v47 = vmax.f32 %v670_v46, 0.0 }
 0x132   : > { %724 = vperm.xlu2 %1175, %v674_v47  }
 0x140   : > { %v1467_v60 = vpop.permute.xlu0 %719 }
 0x14c   : > { %v667_v48 = vpop.xlane.xlu2 %666 }
 0x14d   : > { %v671_v49 = vadd.f32 %v667_v48, %v1382_v28  ;;  %v898_v48 = vmul.f32 %v1180_v12, %v1302_v7 }
 0x14f   : > { %v675_v52 = vmax.f32 %v671_v49, 0.0  ;;  %v902_v49 = vsel %vm478_vm0, %v898_v48, 0.0 }
 0x151   : > { %729 = vperm.xlu1 %1176, %v675_v52  }
 0x154   : > { %v658_v53 = vpop.xlane.xlu2 %657 }
 0x155   : > { %v668_v56 = vadd.f32 %v658_v53, %v1409_v43 }
 0x157   : > { %v672_v57 = vmax.f32 %v668_v56, 0.0 }
 0x159   : > { %714 = vperm.xlu1 %1176, %v672_v57  }
 0x15b   : > { %786 = vadd.xlane.f32.xlu2 %v785_v58 }
 0x16b   : > { %v790_v61 = vpop.xlane.xlu0 %789 }
 0x16c   : > { %v794_v62 = vadd.f32 %v790_v61, %v1382_v28 }
 0x16e   : > { %v798_v1 = vmax.f32 %v794_v62, 0.0 }
 0x173   : > { %852 = vperm.xlu2 %1175, %v798_v1   ;;  %v781_v3 = vpop.xlane.xlu0 %780 }
 0x174   : > { %v791_v4 = vadd.f32 %v781_v3, %v1409_v43 }
 0x176   : > { %v795_v5 = vmax.f32 %v791_v4, 0.0 }
 0x17b   : > { %837 = vperm.xlu2 %1175, %v795_v5  }
 0x183   : > { %783 = vadd.xlane.f32.xlu1 %v782_v9 }
 0x193   : > { %v638_v10 = vpop.f32.mrf.mxu2 }
 0x194   : > { %v639_v11 = vadd.f32 %v638_v10, %v1460_v44 }
 0x196   : > { %v641_v13 = vmul.f32 0.34659976, %v639_v11  ;;  %v645_v19 = vmul.f32 0.23920926, %v639_v11 }
 0x198   : > { %v642_v16 = vsub.f32 %v1327_v15, %v641_v13  ;;  %v725_v15 = vpop.permute.xlu2 %724 }
 0x19a   : > { %v643_v18 = vmul.f32 1.0660832, %v642_v16 }
 0x19c   : > { %v644_v20 = vmul.f32 0.970968, %v643_v18 }
 0x19e   : > { %v1475_v22 = vadd.f32 %v645_v19, %v644_v20 }
 0x1a0   : > { %1126 = vmatpush.msk.msra.mxu3 %vm433_vm1, %v1475_v22 }
 0x1a1   : > { %1127 = vmatmul.msk.f32.vlgmr.msra.gmra.mxu3 %vm420_vm2, %v1370_v24 }
 0x1a4   : > { %906 = vadd.xlane.f32.xlu2 %v905_v27 }
 0x1a9   : > { %1128 = vmatmul.msk.f32.gmra.mxu3 %vm420_vm2, %v1324_v14 }
 0x1b1   : > { %1129 = vmatmul.msk.f32.gmra.mxu3 %vm420_vm2, %v1351_v21 }
 0x1b9   : > { %1130 = vmatmul.msk.f32.gmra.mxu3 %vm420_vm2, %v1362_v23 }
 0x1c3   : > { %v730_v33 = vpop.permute.xlu1 %729 }
 0x1cb   : > { %v715_v2 = vpop.permute.xlu1 %714 }
 0x1ce   : > { %v787_v30 = vpop.xlane.xlu2 %786 }
 0x1cf   : > { %v793_v31 = vadd.f32 %v787_v30, %v1394_v36 }
 0x1d1   : > { %v797_v32 = vmax.f32 %v793_v31, 0.0 }
 0x1d3   : > { %847 = vperm.xlu1 %1176, %v797_v32  }
 0x1d6   : > { %v1498_v46 = vpop.permute.xlu2 %852 }
 0x1de   : > { %v1502_v52 = vpop.permute.xlu2 %837 }
 0x1f6   : > { %v784_v34 = vpop.xlane.xlu1 %783 }
 0x1f7   : > { %v792_v37 = vadd.f32 %v784_v34, %v1387_v29 }
 0x1f9   : > { %v796_v38 = vmax.f32 %v792_v37, 0.0 }
 0x1fb   : > { %842 = vperm.xlu0 %1174, %v796_v38  }
 0x1fd   : > { %909 = vadd.xlane.f32.xlu1 %v908_v40 }
 0x217   : > { %v907_v54 = vpop.xlane.xlu2 %906 }
 0x218   : > { %v915_v0 = vadd.f32 %v907_v54, %v1387_v29 }
 0x21a   : > { %v919_v1 = vmax.f32 %v915_v0, 0.0 }
 0x224   : > { %v696_v47 = vpop.f32.mrf.mxu3 }
 0x225   : > { %912 = vadd.xlane.f32.xlu0 %v911_v45  ;;  %v708_v61 = vadd.f32 %v696_v47, %v1419_v51 }
 0x227   : > { %v732_v5 = vadd.f32 %v715_v2, %v708_v61 }
 0x229   : > { %v736_v13 = vadd.f32 %v732_v5, %v1450_v39 }
 0x22b   : > { %v740_v18 = vmax.f32 %v736_v13, 0.0 }
 0x22c   : > { %v699_v6 = vpop.f32.mrf.mxu3 }
 0x22d   : > { %903 = vadd.xlane.f32.xlu0 %v902_v49  ;;  %v709_v57 = vadd.f32 %v699_v6, %v1422_v55 }
 0x22f   : > { %v733_v3 = vadd.f32 %v1467_v60, %v709_v57 }
 0x231   : > { %v737_v29 = vadd.f32 %v733_v3, %v1445_v26 }
 0x233   : > { %v741_v16 = vmax.f32 %v737_v29, 0.0 }
 0x234   : > { %v702_v53 = vpop.f32.mrf.mxu3 }
 0x235   : > { %v710_v56 = vadd.f32 %v702_v53, %v1425_v59 }
 0x237   : > { %v734_v62 = vadd.f32 %v725_v15, %v710_v56 }
 0x239   : > { %v738_v9 = vadd.f32 %v734_v62, %v1439_v17 }
 0x23b   : > { %v742_v11 = vmax.f32 %v738_v9, 0.0 }
 0x23c   : > { %v705_v58 = vpop.f32.mrf.mxu3 }
 0x23d   : > { %v711_v7 = vadd.f32 %v705_v58, %v1429_v63 }
 0x23f   : > { %v735_v4 = vadd.f32 %v730_v33, %v711_v7 }
 0x241   : > { %965 = vperm.xlu0 %1174, %v919_v1   ;;  %v739_v8 = vadd.f32 %v735_v4, %v1417_v50 }
 0x243   : > { %v743_v10 = vmax.f32 %v739_v8, 0.0 }
 0x245   : > { %756 = vmatpush.msrb.mxu2 %v743_v10  ;;  %v848_v60 = vpop.permute.xlu1 %847 }
 0x247   : > { %757 = vmatpush.msrb.mxu2 %v742_v11 }
 0x249   : > { %758 = vmatpush.msrb.mxu2 %v741_v16 }
 0x24b   : > { %759 = vmatpush.msrb.mxu2 %v740_v18 }
 0x24c   : > { %1131 = vmatmul.msk.f32.vlgmr.msrb.gmra.mxu2 %vm478_vm0, %v1456_v42 }
 0x26d   : > { %v843_v25 = vpop.permute.xlu0 %842 }
 0x270   : > { %v910_v19 = vpop.xlane.xlu1 %909 }
 0x271   : > { %v916_v20 = vadd.f32 %v910_v19, %v1394_v36 }
 0x273   : > { %v920_v12 = vmax.f32 %v916_v20, 0.0 }
 0x275   : > { %970 = vperm.xlu2 %1175, %v920_v12  }
 0x298   : > { %v913_v27 = vpop.xlane.xlu0 %912 }
 0x299   : > { %v917_v15 = vadd.f32 %v913_v27, %v1382_v28 }
 0x29b   : > { %v921_v30 = vmax.f32 %v917_v15, 0.0 }
 0x29d   : > { %975 = vperm.xlu1 %1176, %v921_v30  }
 0x2a0   : > { %v904_v31 = vpop.xlane.xlu0 %903 }
 0x2a1   : > { %v914_v32 = vadd.f32 %v904_v31, %v1409_v43 }
 0x2a3   : > { %v918_v33 = vmax.f32 %v914_v32, 0.0 }
 0x2a5   : > { %960 = vperm.xlu0 %1174, %v918_v33  }
 0x2cf   : > { %v761_v2 = vpop.f32.mrf.mxu2  ;;  %v971_v12 = vpop.permute.xlu2 %970 }
 0x2d0   : > { %v762_v34 = vadd.f32 %v761_v2, %v1460_v44 }
 0x2d2   : > { %v764_v35 = vmul.f32 0.23920926, %v762_v34  ;;  %v768_v40 = vmul.f32 0.12731683, %v762_v34 }
 0x2d4   : > { %v765_v37 = vsub.f32 %v1475_v22, %v764_v35 }
 0x2d6   : > { %v766_v36 = vmul.f32 1.0299001, %v765_v37 }
 0x2d8   : > { %v767_v38 = vmul.f32 0.9918621, %v766_v36 }
 0x2da   : > { %v769_v41 = vadd.f32 %v768_v40, %v767_v38 }
 0x2dc   : > { %1133 = vmatpush.msk.msra.mxu2 %vm433_vm1, %v769_v41 }
 0x2dd   : > { %1134 = vmatmul.msk.f32.vlgmr.msra.gmra.mxu2 %vm420_vm2, %v1370_v24 }
 0x2e5   : > { %1135 = vmatmul.msk.f32.gmra.mxu2 %vm420_vm2, %v1324_v14 }
 0x2ed   : > { %1136 = vmatmul.msk.f32.gmra.mxu2 %vm420_vm2, %v1351_v21 }
 0x2f5   : > { %1137 = vmatmul.msk.f32.gmra.mxu2 %vm420_vm2, %v1362_v23 }
 0x30f   : > { %v976_v15 = vpop.permute.xlu1 %975 }
 0x360   : > { %v819_v28 = vpop.f32.mrf.mxu2 }
 0x361   : > { %v831_v49 = vadd.f32 %v819_v28, %v1419_v51 }
 0x363   : > { %v855_v0 = vadd.f32 %v1502_v52, %v831_v49 }
 0x365   : > { %v859_v7 = vadd.f32 %v855_v0, %v1450_v39 }
 0x367   : > { %v863_v4 = vmax.f32 %v859_v7, 0.0 }
 0x368   : > { %v822_v43 = vpop.f32.mrf.mxu2 }
 0x369   : > { %v832_v47 = vadd.f32 %v822_v43, %v1422_v55 }
 0x36b   : > { %v856_v54 = vadd.f32 %v843_v25, %v832_v47 }
 0x36d   : > { %v860_v62 = vadd.f32 %v856_v54, %v1445_v26 }
 0x36f   : > { %v864_v3 = vmax.f32 %v860_v62, 0.0 }
 0x370   : > { %v825_v22 = vpop.f32.mrf.mxu2 }
 0x371   : > { %v833_v45 = vadd.f32 %v825_v22, %v1425_v59 }
 0x373   : > { %v857_v6 = vadd.f32 %v848_v60, %v833_v45  ;;  %v966_v60 = vpop.permute.xlu0 %965 }
 0x375   : > { %v861_v58 = vadd.f32 %v857_v6, %v1439_v17 }
 0x377   : > { %v865_v1 = vmax.f32 %v861_v58, 0.0 }
 0x378   : > { %v828_v48 = vpop.f32.mrf.mxu2 }
 0x379   : > { %v834_v53 = vadd.f32 %v828_v48, %v1429_v63 }
 0x37b   : > { %v858_v56 = vadd.f32 %v1498_v46, %v834_v53  ;;  %v961_v31 = vpop.permute.xlu0 %960 }
 0x37d   : > { %v862_v57 = vadd.f32 %v858_v56, %v1417_v50 }
 0x37f   : > { %v866_v61 = vmax.f32 %v862_v57, 0.0 }
 0x381   : > { %879 = vmatpush.msra.mxu0 %v866_v61 }
 0x383   : > { %880 = vmatpush.msra.mxu0 %v865_v1 }
 0x385   : > { %881 = vmatpush.msra.mxu0 %v864_v3 }
 0x387   : > { %882 = vmatpush.msra.mxu0 %v863_v4 }
 0x388   : > { %1138 = vmatmul.msk.f32.vlgmr.msra.gmra.mxu0 %vm478_vm0, %v1456_v42 }
 0x405   : > { %v884_v46 = vpop.f32.mrf.mxu0 }
 0x406   : > { %v885_v52 = vadd.f32 %v884_v46, %v1460_v44 }
 0x408   : > { %v887_v5 = vmul.f32 0.12731683, %v885_v52  ;;  %v891_v29 = vmul.f32 0.01, %v885_v52 }
 0x40a   : > { %v888_v8 = vsub.f32 %v769_v41, %v887_v5 }
 0x40c   : > { %v889_v9 = vmul.f32 1.0082047, %v888_v8 }
 0x40e   : > { %v890_v10 = vmul.f32 0.99995, %v889_v9 }
 0x410   : > { %v892_v11 = vadd.f32 %v891_v29, %v890_v10 }
 0x412   : > { %1140 = vmatpush.msk.msrb.mxu1 %vm433_vm1, %v892_v11 }
 0x413   : > { %1141 = vmatmul.msk.f32.vlgmr.msrb.gmra.mxu1 %vm420_vm2, %v1370_v24 }
 0x41b   : > { %1142 = vmatmul.msk.f32.gmra.mxu1 %vm420_vm2, %v1324_v14 }
 0x423   : > { %1143 = vmatmul.msk.f32.gmra.mxu1 %vm420_vm2, %v1351_v21 }
 0x42b   : > { %1144 = vmatmul.msk.f32.gmra.mxu1 %vm420_vm2, %v1362_v23 }
 0x490   : > { %v942_v13 = vpop.f32.mrf.mxu1 }
 0x491   : > { %v954_v24 = vadd.f32 %v942_v13, %v1419_v51 }
 0x493   : > { %v978_v23 = vadd.f32 %v961_v31, %v954_v24 }
 0x495   : > { %v982_v51 = vadd.f32 %v978_v23, %v1450_v39 }
 0x498   : > { %v945_v16 = vpop.f32.mrf.mxu1 }
 0x499   : > { %v955_v20 = vadd.f32 %v945_v16, %v1422_v55 }
 0x49b   : > { %v979_v21 = vadd.f32 %v966_v60, %v955_v20 }
 0x4a0   : > { %v948_v18 = vpop.f32.mrf.mxu1 }
 0x4a1   : > { %v956_v19 = vadd.f32 %v948_v18, %v1425_v59  ;;  %v983_v59 = vadd.f32 %v979_v21, %v1445_v26 }
 0x4a3   : > { %v980_v27 = vadd.f32 %v971_v12, %v956_v19  ;;  %v987_v34 = vmax.f32 %v983_v59, 0.0 }
 0x4a5   : > { %v984_v33 = vadd.f32 %v980_v27, %v1439_v17 }
 0x4a7   : > { %v988_v55 = vmax.f32 %v984_v33, 0.0 }
 0x4a8   : > { %v951_v25 = vpop.f32.mrf.mxu1 }
 0x4a9   : > { %v957_v14 = vadd.f32 %v951_v25, %v1429_v63  ;;  %v986_v63 = vmax.f32 %v982_v51, 0.0 }
 0x4ab   : > { %v981_v30 = vadd.f32 %v976_v15, %v957_v14 }
 0x4ad   : > { %v985_v32 = vadd.f32 %v981_v30, %v1417_v50 }
 0x4af   : > { %v989_v2 = vmax.f32 %v985_v32, 0.0 }
 0x4b1   : > { %1002 = vmatpush.msrb.mxu3 %v989_v2 }
 0x4b3   : > { %1003 = vmatpush.msrb.mxu3 %v988_v55 }
 0x4b5   : > { %1004 = vmatpush.msrb.mxu3 %v987_v34 }
 0x4b7   : > { %1005 = vmatpush.msrb.mxu3 %v986_v63 }
 0x4b8   : > { %1145 = vmatmul.msk.f32.vlgmr.msrb.gmra.mxu3 %vm478_vm0, %v1456_v42 }
 0x53b   : > { %v1007_v35 = vpop.f32.mrf.mxu3 }
 0x53c   : > { %v1008_v50 = vadd.f32 %v1007_v35, %v1460_v44 }
 0x53e   : > { %v1010_v17 = vmul.f32 0.01, %v1008_v50  ;;  %v1013_v26 = vmul.f32 0.0, %v1008_v50 }
 0x540   : > { %v1011_v37 = vsub.f32 %v892_v11, %v1010_v17 }
 0x542   : > { %v1012_v36 = vmul.f32 1.00005, %v1011_v37 }
 0x544   : > { %v1014_v39 = vadd.f32 %v1013_v26, %v1012_v36 }
 0x546   : > { %1016 = vst.msk [vmem:[%s413_s30] sm:$0x7] %vm1015_vm3, %v1014_v39 }
 0x547 PF: > { %s20_s15 = sadd.s32 1, %s1203_s15   ;;  %s1587_s13 = smov %s1199_s14 }
 0x548   : > { %p17_p5 = scmp.ge.s32.totalorder %s20_s15, 4   ;;  %s1588_s14 = smov %s1590_s16 }
 0x54a   :  { %19 = sbr.rel (!%p17_p5) target bundleno = 2 (0x2), region = 96 }

// kernel: diffusion_net_forward.15
= control target key start
LH: loop header
LB: loop body
LE: loop exit
PB: predicated region body
PF: predicated region fallthrough
CT: control target
= control target key end

     0   :  { %vm116_vm0 = vcmask 1040384   ;;  %vm120_vm1 = vcmask 1041408   ;;  %vm124_vm2 = vcmask 1042432   ;;  %vm131_vm3 = vcmask 1043456   ;;  %s171_s0 = inlined_call_operand.vmem [shape: f32[4,384], index: 0, kind: input, shape index: {}]   ;;  %s172_s1 = inlined_call_operand.vmem [shape: f32[4,384], index: 1, kind: output, shape index: {}]  }
   0x1   :  { %v8_v0 = vld [vmem:[%s171_s0] sm:$0xff]  ;;  %v9_v1 = vld [vmem:[%s171_s0 + $0x8] sm:$0xf] }
   0x2   :  { %v10_v2 = vmul.f32 0.5, %v8_v0  ;;  %v11_v3 = vmul.f32 0.5, %v9_v1 }
   0x4   :  { %v14_v4 = vrot.slane %v10_v2, 5  ;;  %v22_v5 = vrot.slane %v10_v2, 6  ;;  %v30_v6 = vrot.slane %v10_v2, 7  ;;  %v16_v7 = vrot.slane %v11_v3, 5 }
   0x5   :  { %v24_v8 = vrot.slane %v11_v3, 6  ;;  %v32_v9 = vrot.slane %v11_v3, 7 }
   0x6   :  { %v15_v10 = vrot.slane %v14_v4, 4  ;;  %v23_v11 = vrot.slane %v22_v5, 4  ;;  %v17_v12 = vrot.slane %v16_v7, 4  ;;  %v31_v13 = vrot.slane %v30_v6, 4 }
   0x7   :  { %v25_v14 = vrot.slane %v24_v8, 4  ;;  %v33_v19 = vrot.slane %v32_v9, 4 }
   0x8   :  { %v20_v15 = vsub.f32 %v10_v2, %v15_v10  ;;  %v38_v16 = vadd.f32 %v15_v10, %v10_v2  ;;  %v21_v17 = vsub.f32 %v11_v3, %v17_v12  ;;  %v39_v18 = vadd.f32 %v17_v12, %v11_v3 }
   0xa   :  { %v28_v20 = vsub.f32 %v20_v15, %v23_v11  ;;  %v40_v21 = vsub.f32 %v38_v16, %v23_v11  ;;  %v44_v22 = vadd.f32 %v23_v11, %v20_v15  ;;  %v48_v23 = vadd.f32 %v38_v16, %v23_v11 }
   0xb   :  { %v29_v24 = vsub.f32 %v21_v17, %v25_v14  ;;  %v41_v25 = vsub.f32 %v39_v18, %v25_v14  ;;  %v45_v26 = vadd.f32 %v25_v14, %v21_v17  ;;  %v49_v27 = vadd.f32 %v39_v18, %v25_v14 }
   0xc   :  { %v36_v28 = vadd.f32 %v31_v13, %v28_v20  ;;  %v42_v29 = vsub.f32 %v40_v21, %v31_v13  ;;  %v46_v30 = vsub.f32 %v44_v22, %v31_v13  ;;  %v50_v31 = vadd.f32 %v48_v23, %v31_v13 }
   0xd   :  { %v37_v32 = vadd.f32 %v33_v19, %v29_v24  ;;  %v43_v33 = vsub.f32 %v41_v25, %v33_v19  ;;  %v47_v34 = vsub.f32 %v45_v26, %v33_v19  ;;  %v51_v35 = vadd.f32 %v49_v27, %v33_v19 }
   0xe   :  { %v52_v36 = vadd.f32 1.0, %v36_v28  ;;  %v60_v37 = vadd.f32 1.0, %v42_v29  ;;  %v68_v38 = vadd.f32 1.0, %v46_v30  ;;  %v76_v39 = vadd.f32 1.0, %v50_v31 }
   0xf   :  { %v53_v40 = vadd.f32 1.0, %v37_v32  ;;  %v61_v41 = vadd.f32 1.0, %v43_v33  ;;  %v69_v42 = vadd.f32 1.0, %v47_v34  ;;  %v77_v43 = vadd.f32 1.0, %v51_v35 }
  0x10   :  { %v54_v44 = vmul.f32 0.5, %v52_v36  ;;  %v62_v45 = vmul.f32 0.5, %v60_v37  ;;  %v70_v46 = vmul.f32 0.5, %v68_v38  ;;  %v78_v47 = vmul.f32 0.5, %v76_v39 }
  0x11   :  { %v55_v48 = vmul.f32 0.5, %v53_v40  ;;  %v63_v49 = vmul.f32 0.5, %v61_v41  ;;  %v71_v50 = vmul.f32 0.5, %v69_v42  ;;  %v79_v51 = vmul.f32 0.5, %v77_v43 }
  0x12   :  { %v56_v52 = vmax.f32 %v54_v44, 0.0  ;;  %v64_v53 = vmax.f32 %v62_v45, 0.0  ;;  %v72_v54 = vmax.f32 %v70_v46, 0.0  ;;  %v80_v55 = vmax.f32 %v78_v47, 0.0 }
  0x13   :  { %v57_v56 = vmax.f32 %v55_v48, 0.0  ;;  %v65_v57 = vmax.f32 %v63_v49, 0.0  ;;  %v73_v58 = vmax.f32 %v71_v50, 0.0  ;;  %v81_v59 = vmax.f32 %v79_v51, 0.0 }
  0x14   :  { %v58_v60 = vmin.f32 %v56_v52, 1.0  ;;  %v66_v61 = vmin.f32 %v64_v53, 1.0  ;;  %v74_v62 = vmin.f32 %v72_v54, 1.0  ;;  %v82_v63 = vmin.f32 %v80_v55, 1.0 }
  0x15   :  { %v59_v0 = vmin.f32 %v57_v56, 1.0  ;;  %v67_v1 = vmin.f32 %v65_v57, 1.0  ;;  %v75_v2 = vmin.f32 %v73_v58, 1.0  ;;  %v83_v3 = vmin.f32 %v81_v59, 1.0 }
  0x16   :  { %v86_v4 = vperm.slane %v58_v60, 0  ;;  %v87_v5 = vperm.slane %v58_v60, 4  ;;  %v94_v6 = vperm.slane %v66_v61, 0  ;;  %v95_v7 = vperm.slane %v66_v61, 4 }
  0x17   :  { %v102_v8 = vperm.slane %v74_v62, 0  ;;  %v103_v9 = vperm.slane %v74_v62, 4  ;;  %v110_v10 = vperm.slane %v82_v63, 0  ;;  %v111_v11 = vperm.slane %v82_v63, 4 }
  0x18   :  { %v117_v12 = vsel %vm116_vm0, %v86_v4, %v94_v6  ;;  %v118_v13 = vsel %vm116_vm0, %v87_v5, %v95_v7  ;;  %v88_v14 = vperm.slane %v59_v0, 0  ;;  %v96_v15 = vperm.slane %v67_v1, 0 }
  0x19   :  { %v121_v16 = vsel %vm120_vm1, %v117_v12, %v102_v8  ;;  %v122_v17 = vsel %vm120_vm1, %v118_v13, %v103_v9  ;;  %v104_v18 = vperm.slane %v75_v2, 0  ;;  %v112_v19 = vperm.slane %v83_v3, 0 }
  0x1a   :  { %v125_v20 = vsel %vm124_vm2, %v121_v16, %v110_v10  ;;  %v126_v21 = vsel %vm124_vm2, %v122_v17, %v111_v11  ;;  %v119_v22 = vsel %vm116_vm0, %v88_v14, %v96_v15 }
  0x1b   :  { %v130_v23 = vrot.slane %v126_v21, 4  ;;  %v123_v24 = vsel %vm120_vm1, %v119_v22, %v104_v18 }
  0x1c   :  { %v127_v25 = vsel %vm124_vm2, %v123_v24, %v112_v19 }
  0x1d   :  { %v132_v26 = vsel %vm131_vm3, %v125_v20, %v130_v23  ;;  %135 = vst [vmem:[%s172_s1 + $0x8] sm:$0xf] %v127_v25 }
  0x1e   :  { %134 = vst [vmem:[%s172_s1] sm:$0xff] %v132_v26 }

</bundles_post_ra>
